<compile_context>
chip_gen: v6e
topology: v6e:2x2x1
jax: 0.10.0
libtpu: 0.0.40
codegen_flags: <defaults>
</compile_context>

<pallas_src>
import functools

import jax
import jax.numpy as jnp
from jax.experimental import pallas as pl
from jax.experimental.pallas import tpu as pltpu


def _relu6(x):
    return jnp.clip(x, 0.0, 6.0)


# --------------------------------- kernel ---------------------------------

def _dwblock_kernel(x_ref, w1_ref, b1_ref, wd_ref, b2_ref, w3_ref, b3_ref,
                    o_ref, hp_ref, *, H, W, TH, use_res):
    hidden = w1_ref.shape[1]
    Cin = x_ref.shape[-1]
    Cout = w3_ref.shape[1]

    # First output row of this row tile (in original-image coordinates).
    row0 = pl.multiple_of(pl.program_id(1) * TH, TH)

    # ---- 1) expand: 1x1 conv (bf16 MXU, f32 acc) + bias + ReLU6 over TH+2 rows ----
    # x_ref holds the H-zero-padded image (H+2 rows); rows [row0, row0+TH+2) are the TH
    # output rows plus a 1-row halo on each side needed by the 3x3 depthwise conv.
    x_ext = x_ref[pl.ds(row0, TH + 2), :, :]                          # (TH+2, W, Cin) f32
    h = jnp.dot(x_ext.reshape((TH + 2) * W, Cin).astype(jnp.bfloat16),
                w1_ref[...], preferred_element_type=jnp.float32)      # (rows, hidden) f32
    h = _relu6(h + b1_ref[...]).reshape(TH + 2, W, hidden)

    # The depthwise conv zero-pads h (not x): halo rows that fall outside the image must be
    # zero (the zero-padded x rows would otherwise give relu6(b1) != 0), so mask them.
    top_ok = jnp.where(row0 > 0, 1.0, 0.0)
    bot_ok = jnp.where(row0 + TH < H, 1.0, 0.0)

    # ---- 2) stage h into the zero-padded VMEM scratch (no concatenate copies) ----
    zcol = jnp.zeros((TH + 2, 1, hidden), jnp.float32)
    hp_ref[:, 0:1, :] = zcol                                          # left pad column
    hp_ref[:, W + 1:W + 2, :] = zcol                                  # right pad column
    hp_ref[1:TH + 1, 1:W + 1, :] = h[1:TH + 1]                        # interior rows
    hp_ref[0:1, 1:W + 1, :] = h[0:1] * top_ok                         # top halo row
    hp_ref[TH + 1:TH + 2, 1:W + 1, :] = h[TH + 1:TH + 2] * bot_ok     # bottom halo row

    # ---- 3) 3x3 depthwise (BN scale pre-folded into taps) + bias + ReLU6 ----
    # Hoist the W (sublane) shift: 3 shifted slab loads, each reused for 3 dy MACs.
    taps = wd_ref[...]                                                # (9, hidden) f32
    acc = jnp.zeros((TH, W, hidden), jnp.float32)
    for dx in range(3):
        slab = hp_ref[:, dx:dx + W, :]                                # (TH+2, W, hidden)
        for dy in range(3):
            tap = taps[dy * 3 + dx].reshape(1, 1, hidden)
            acc = acc + slab[dy:dy + TH] * tap
    h2 = _relu6(acc + b2_ref[...].reshape(1, 1, hidden))              # (TH, W, hidden)

    # ---- 4) project: 1x1 conv (bf16 MXU, f32 acc) + bias (+ residual, f32) ----
    y = jnp.dot(h2.reshape(TH * W, hidden).astype(jnp.bfloat16),
                w3_ref[...], preferred_element_type=jnp.float32)      # (TH*W, Cout) f32
    y = y + b3_ref[...]
    if use_res:
        y = y + x_ext[1:TH + 1].reshape(TH * W, Cin)                  # Cin == Cout
    o_ref[...] = y.reshape(TH, W, Cout)


# --------------------------------- wrappers ---------------------------------

def dwblock_forward_nhwc(x_nhwc, kparams, *, stride=1, res_connect=None, row_tile=8):
    """Native NHWC entry point (avoids NCHW<->NHWC HBM round trips in a real pipeline)."""
    assert stride == 1, "TODO(synk): stride=2 depthwise path not implemented"
    x = x_nhwc.astype(jnp.float32)
    N, H, W, Cin = x.shape
    hidden = kparams["w1"].shape[1]
    Cout = kparams["w3"].shape[1]

    use_res = (stride == 1 and Cin == Cout)
    if res_connect is not None:
        use_res = bool(res_connect) and use_res

    TH = row_tile if (row_tile and H % row_tile == 0) else H
    num_t = H // TH

    # Zero halo rows along H so every row tile can read a fixed-size (TH+2)-row window.
    x_pad = jnp.pad(x, ((0, 0), (1, 1), (0, 0), (0, 0)))

    kernel = functools.partial(_dwblock_kernel, H=H, W=W, TH=TH, use_res=use_res)

    def full(arr):
        nd = arr.ndim
        return pl.BlockSpec(arr.shape, lambda n, t, _nd=nd: (0,) * _nd)

    flops = 2 * N * H * W * (Cin * hidden + 9 * hidden + hidden * Cout)
    bytes_accessed = int(4 * (x.size + N * H * W * Cout)
                         + sum(int(v.size) * v.dtype.itemsize for v in kparams.values()))
    cost = pl.CostEstimate(flops=flops, transcendentals=0, bytes_accessed=bytes_accessed)

    out = pl.pallas_call(
        kernel,
        out_shape=jax.ShapeDtypeStruct((N, H, W, Cout), jnp.float32),
        grid=(N, num_t),
        in_specs=[
            pl.BlockSpec((None, H + 2, W, Cin), lambda n, t: (n, 0, 0, 0)),
            full(kparams["w1"]), full(kparams["b1"]),
            full(kparams["wd"]), full(kparams["b2"]),
            full(kparams["w3"]), full(kparams["b3"]),
        ],
        out_specs=pl.BlockSpec((None, TH, W, Cout), lambda n, t: (n, t, 0, 0)),
        scratch_shapes=[pltpu.VMEM((TH + 2, W + 2, hidden), jnp.float32)],
        compiler_params=pltpu.CompilerParams(
            dimension_semantics=("parallel", "parallel"),
            vmem_limit_bytes=32 * 1024 * 1024),
        cost_estimate=cost,
    )(x_pad, kparams["w1"], kparams["b1"], kparams["wd"], kparams["b2"],
      kparams["w3"], kparams["b3"])
    return out


def dwblock_forward(x_nchw, kparams, **kw):
    """NCHW convenience wrapper matching the PyTorch module convention."""
    x = jnp.transpose(x_nchw, (0, 2, 3, 1))
    y = dwblock_forward_nhwc(x, kparams, **kw)
    return jnp.transpose(y, (0, 3, 1, 2))


# ----------------------- parameter construction / BN folding -----------------------

def _fold_bn(gamma, beta, mean, var, eps=1e-5):
    scale = gamma / jnp.sqrt(var + eps)
    return scale, beta - mean * scale


def init_raw_params(key, inp, oup, hidden):
    ks = jax.random.split(key, 6)

    def bn(k, c):
        k1, k2, k3, k4 = jax.random.split(k, 4)
        return dict(
            gamma=1.0 + 0.1 * jax.random.normal(k1, (c,), jnp.float32),
            beta=0.1 * jax.random.normal(k2, (c,), jnp.float32),
            mean=0.1 * jax.random.normal(k3, (c,), jnp.float32),
            var=1.0 + 0.1 * jnp.abs(jax.random.normal(k4, (c,), jnp.float32)))

    return dict(
        w1=0.3 * jax.random.normal(ks[0], (inp, hidden), jnp.float32),    # expand 1x1
        bn1=bn(ks[1], hidden),
        wd=0.3 * jax.random.normal(ks[2], (9, hidden), jnp.float32),      # dw 3x3, k = ky*3+kx
        bn2=bn(ks[3], hidden),
        w3=0.3 * jax.random.normal(ks[4], (hidden, oup), jnp.float32),    # project 1x1
        bn3=bn(ks[5], oup))


def fold_params(raw):
    """Fold BN scales into the conv weights (host-side); keep biases. bf16 for the MXU weights."""
    s1, b1 = _fold_bn(**raw["bn1"])
    s2, b2 = _fold_bn(**raw["bn2"])
    s3, b3 = _fold_bn(**raw["bn3"])
    return dict(
        w1=(raw["w1"] * s1[None, :]).astype(jnp.bfloat16),
        b1=b1.reshape(1, -1).astype(jnp.float32),
        wd=(raw["wd"] * s2[None, :]).astype(jnp.float32),
        b2=b2.reshape(1, -1).astype(jnp.float32),
        w3=(raw["w3"] * s3[None, :]).astype(jnp.bfloat16),
        b3=b3.reshape(1, -1).astype(jnp.float32))


# ------------------------------- pure-JAX references -------------------------------

def ref_forward_f32(x_nchw, raw, use_res=True):
    """Full-f32 module semantics: conv1x1+BN+ReLU6 -> dw3x3+BN+ReLU6 -> conv1x1+BN (+x)."""
    hp = jax.lax.Precision.HIGHEST
    x = jnp.transpose(x_nchw, (0, 2, 3, 1)).astype(jnp.float32)
    s1, b1 = _fold_bn(**raw["bn1"])
    s2, b2 = _fold_bn(**raw["bn2"])
    s3, b3 = _fold_bn(**raw["bn3"])
    h = jnp.einsum("nhwc,cd->nhwd", x, raw["w1"], precision=hp)
    h = jnp.clip(h * s1 + b1, 0.0, 6.0)
    wd = raw["wd"].reshape(3, 3, 1, -1)
    dw = jax.lax.conv_general_dilated(
        h, wd, window_strides=(1, 1), padding="SAME",
        dimension_numbers=("NHWC", "HWIO", "NHWC"),
        feature_group_count=h.shape[-1], precision=hp)
    h2 = jnp.clip(dw * s2 + b2, 0.0, 6.0)
    y = jnp.einsum("nhwc,cd->nhwd", h2, raw["w3"], precision=hp)
    y = y * s3 + b3
    if use_res:
        y = y + x
    return jnp.transpose(y, (0, 3, 1, 2))


def ref_forward_mixed(x_nchw, kp, use_res=True):
    """Mirrors the kernel's numerics: folded BN, bf16 MXU inputs, f32 accumulation."""
    x = jnp.transpose(x_nchw, (0, 2, 3, 1)).astype(jnp.float32)
    N, H, W, _ = x.shape
    h = jnp.einsum("nhwc,cd->nhwd", x.astype(jnp.bfloat16), kp["w1"],
                   preferred_element_type=jnp.float32)
    h = jnp.clip(h + kp["b1"].reshape(-1), 0.0, 6.0)
    hpad = jnp.pad(h, ((0, 0), (1, 1), (1, 1), (0, 0)))
    acc = jnp.zeros_like(h)
    for dx in range(3):                                 # same accumulation order as the kernel
        for dy in range(3):
            acc = acc + hpad[:, dy:dy + H, dx:dx + W, :] * kp["wd"][dy * 3 + dx]
    h2 = jnp.clip(acc + kp["b2"].reshape(-1), 0.0, 6.0)
    y = jnp.einsum("nhwc,cd->nhwd", h2.astype(jnp.bfloat16), kp["w3"],
                   preferred_element_type=jnp.float32)
    y = y + kp["b3"].reshape(-1)
    if use_res:
        y = y + x
    return jnp.transpose(y, (0, 3, 1, 2))


# ------------------------------------ main ------------------------------------

if __name__ == "__main__":
    N, inp, oup, H, W = 2, 4, 4, 16, 16
    expand_ratio = 6
    hidden = int(round(inp * expand_ratio))  # 24

    key = jax.random.PRNGKey(0)
    kx, kp_key = jax.random.split(key)
    x = jax.random.normal(kx, (N, inp, H, W), jnp.float32)

    raw = init_raw_params(kp_key, inp, oup, hidden)
    kparams = fold_params(raw)

    out = dwblock_forward(x, kparams)
    out = jax.block_until_ready(out)
    assert out.shape == (N, oup, H, W)

    # Tight check vs. a reference that matches the kernel's mixed-precision numerics.
    ref_m = ref_forward_mixed(x, kparams, use_res=True)
    err_m = float(jnp.max(jnp.abs(out - ref_m)))
    if err_m > 5e-2:
        raise AssertionError(f"mismatch vs mixed-precision reference, max abs err = {err_m}")

    # Loose sanity check vs. the full-f32 module semantics (bf16 MXU drift only).
    ref_f = ref_forward_f32(x, raw, use_res=True)
    err_f = float(jnp.max(jnp.abs(out - ref_f)))
    if err_f > 0.35:
        raise AssertionError(f"mismatch vs f32 module reference, max abs err = {err_f}")

    print("KERNEL_OK")
</pallas_src>

<mosaic_0001>
module attributes {stable_mosaic.version = 11 : i64} {
  func.func @_dwblock_kernel(%arg0: i32, %arg1: i32, %arg2: memref<1x18x16x4xf32, #tpu.memory_space<vmem>>, %arg3: memref<4x24xbf16, #tpu.memory_space<vmem>>, %arg4: memref<1x24xf32, #tpu.memory_space<vmem>>, %arg5: memref<9x24xf32, #tpu.memory_space<vmem>>, %arg6: memref<1x24xf32, #tpu.memory_space<vmem>>, %arg7: memref<24x4xbf16, #tpu.memory_space<vmem>>, %arg8: memref<1x4xf32, #tpu.memory_space<vmem>>, %arg9: memref<1x8x16x4xf32, #tpu.memory_space<vmem>>, %arg10: memref<10x18x24xf32, #tpu.memory_space<vmem>>) attributes {dimension_semantics = [#tpu.dimension_semantics<parallel>, #tpu.dimension_semantics<parallel>], iteration_bounds = array<i64: 2, 2>, scalar_prefetch = 0 : i64, scratch_operands = 1 : i64, tpu.core_type = #tpu.core_type<tc>, window_params = [{transform_indices = @transform_0, window_bounds = array<i64: 1, 18, 16, 4>}, {pipeline_mode = #tpu.pipeline_mode<synchronous>, transform_indices = @transform_1, window_bounds = array<i64: 4, 24>}, {pipeline_mode = #tpu.pipeline_mode<synchronous>, transform_indices = @transform_2, window_bounds = array<i64: 1, 24>}, {pipeline_mode = #tpu.pipeline_mode<synchronous>, transform_indices = @transform_3, window_bounds = array<i64: 9, 24>}, {pipeline_mode = #tpu.pipeline_mode<synchronous>, transform_indices = @transform_4, window_bounds = array<i64: 1, 24>}, {pipeline_mode = #tpu.pipeline_mode<synchronous>, transform_indices = @transform_5, window_bounds = array<i64: 24, 4>}, {pipeline_mode = #tpu.pipeline_mode<synchronous>, transform_indices = @transform_6, window_bounds = array<i64: 1, 4>}, {transform_indices = @transform_7, window_bounds = array<i64: 1, 8, 16, 4>}]} {
    %c8_i32 = arith.constant 8 : i32
    %0 = arith.muli %arg1, %c8_i32 : i32
    %1 = tpu.assume_multiple %0, 8 : i32
    %c0 = arith.constant 0 : index
    %2 = arith.index_cast %1 : i32 to index
    %c0_0 = arith.constant 0 : index
    %c0_1 = arith.constant 0 : index
    %3 = vector.load %arg2[%c0, %2, %c0_0, %c0_1] : memref<1x18x16x4xf32, #tpu.memory_space<vmem>>, vector<1x10x16x4xf32>
    %4 = vector.shape_cast %3 : vector<1x10x16x4xf32> to vector<10x16x4xf32>
    %5 = vector.shape_cast %4 : vector<10x16x4xf32> to vector<160x4xf32>
    %6 = arith.truncf %5 : vector<160x4xf32> to vector<160x4xbf16>
    %c0_2 = arith.constant 0 : index
    %c0_3 = arith.constant 0 : index
    %7 = vector.load %arg3[%c0_2, %c0_3] : memref<4x24xbf16, #tpu.memory_space<vmem>>, vector<4x24xbf16>
    %cst = arith.constant dense<0.000000e+00> : vector<160x24xf32>
    %8 = tpu.matmul %6, %7, %cst {dimension_numbers = #tpu.dot_dimension_numbers<[1], [0], [0], [1], [0, 0, 1, 1], [], []>} : vector<160x4xbf16>, vector<4x24xbf16>, vector<160x24xf32> -> vector<160x24xf32>
    %c0_4 = arith.constant 0 : index
    %c0_5 = arith.constant 0 : index
    %9 = vector.load %arg4[%c0_4, %c0_5] : memref<1x24xf32, #tpu.memory_space<vmem>>, vector<1x24xf32>
    %10 = vector.broadcast %9 : vector<1x24xf32> to vector<160x24xf32>
    %11 = arith.addf %8, %10 : vector<160x24xf32>
    %cst_6 = arith.constant 0.000000e+00 : f32
    %cst_7 = arith.constant 6.000000e+00 : f32
    %12 = vector.broadcast %cst_6 : f32 to vector<160x24xf32>
    %13 = arith.maximumf %12, %11 : vector<160x24xf32>
    %14 = vector.broadcast %cst_7 : f32 to vector<160x24xf32>
    %15 = arith.minimumf %14, %13 : vector<160x24xf32>
    %16 = vector.shape_cast %15 : vector<160x24xf32> to vector<10x16x24xf32>
    %c0_i32 = arith.constant 0 : i32
    %17 = arith.cmpi sgt, %1, %c0_i32 : i32
    %cst_8 = arith.constant 1.000000e+00 : f32
    %cst_9 = arith.constant 0.000000e+00 : f32
    %18 = arith.select %17, %cst_8, %cst_9 : f32
    %c8_i32_10 = arith.constant 8 : i32
    %19 = arith.addi %1, %c8_i32_10 : i32
    %c16_i32 = arith.constant 16 : i32
    %20 = arith.cmpi slt, %19, %c16_i32 : i32
    %cst_11 = arith.constant 1.000000e+00 : f32
    %cst_12 = arith.constant 0.000000e+00 : f32
    %21 = arith.select %20, %cst_11, %cst_12 : f32
    %cst_13 = arith.constant 0.000000e+00 : f32
    %22 = vector.broadcast %cst_13 : f32 to vector<10x1x24xf32>
    %c0_14 = arith.constant 0 : index
    %c0_15 = arith.constant 0 : index
    %c0_16 = arith.constant 0 : index
    %23 = vector.load %arg10[%c0_14, %c0_15, %c0_16] : memref<10x18x24xf32, #tpu.memory_space<vmem>>, vector<10x1x24xf32>
    tpu.vector_store %arg10[%c0_14, %c0_15, %c0_16], %22 {strides = array<i32>} : memref<10x18x24xf32, #tpu.memory_space<vmem>>, vector<10x1x24xf32>,
    %c0_17 = arith.constant 0 : index
    %c17 = arith.constant 17 : index
    %c0_18 = arith.constant 0 : index
    %24 = vector.load %arg10[%c0_17, %c17, %c0_18] : memref<10x18x24xf32, #tpu.memory_space<vmem>>, vector<10x1x24xf32>
    tpu.vector_store %arg10[%c0_17, %c17, %c0_18], %22 {strides = array<i32>} : memref<10x18x24xf32, #tpu.memory_space<vmem>>, vector<10x1x24xf32>,
    %25 = vector.extract_strided_slice %16 {offsets = [1, 0, 0], sizes = [8, 16, 24], strides = [1, 1, 1]} : vector<10x16x24xf32> to vector<8x16x24xf32>
    %c1 = arith.constant 1 : index
    %c1_19 = arith.constant 1 : index
    %c0_20 = arith.constant 0 : index
    %26 = vector.load %arg10[%c1, %c1_19, %c0_20] : memref<10x18x24xf32, #tpu.memory_space<vmem>>, vector<8x16x24xf32>
    tpu.vector_store %arg10[%c1, %c1_19, %c0_20], %25 {strides = array<i32>} : memref<10x18x24xf32, #tpu.memory_space<vmem>>, vector<8x16x24xf32>,
    %27 = vector.extract_strided_slice %16 {offsets = [0, 0, 0], sizes = [1, 16, 24], strides = [1, 1, 1]} : vector<10x16x24xf32> to vector<1x16x24xf32>
    %28 = vector.broadcast %18 : f32 to vector<1x16x24xf32>
    %29 = arith.mulf %27, %28 : vector<1x16x24xf32>
    %c0_21 = arith.constant 0 : index
    %c1_22 = arith.constant 1 : index
    %c0_23 = arith.constant 0 : index
    %30 = vector.load %arg10[%c0_21, %c1_22, %c0_23] : memref<10x18x24xf32, #tpu.memory_space<vmem>>, vector<1x16x24xf32>
    tpu.vector_store %arg10[%c0_21, %c1_22, %c0_23], %29 {strides = array<i32>} : memref<10x18x24xf32, #tpu.memory_space<vmem>>, vector<1x16x24xf32>,
    %31 = vector.extract_strided_slice %16 {offsets = [9, 0, 0], sizes = [1, 16, 24], strides = [1, 1, 1]} : vector<10x16x24xf32> to vector<1x16x24xf32>
    %32 = vector.broadcast %21 : f32 to vector<1x16x24xf32>
    %33 = arith.mulf %31, %32 : vector<1x16x24xf32>
    %c9 = arith.constant 9 : index
    %c1_24 = arith.constant 1 : index
    %c0_25 = arith.constant 0 : index
    %34 = vector.load %arg10[%c9, %c1_24, %c0_25] : memref<10x18x24xf32, #tpu.memory_space<vmem>>, vector<1x16x24xf32>
    tpu.vector_store %arg10[%c9, %c1_24, %c0_25], %33 {strides = array<i32>} : memref<10x18x24xf32, #tpu.memory_space<vmem>>, vector<1x16x24xf32>,
    %c0_26 = arith.constant 0 : index
    %c0_27 = arith.constant 0 : index
    %35 = vector.load %arg5[%c0_26, %c0_27] : memref<9x24xf32, #tpu.memory_space<vmem>>, vector<9x24xf32>
    %cst_28 = arith.constant 0.000000e+00 : f32
    %36 = vector.broadcast %cst_28 : f32 to vector<8x16x24xf32>
    %c0_29 = arith.constant 0 : index
    %c0_30 = arith.constant 0 : index
    %c0_31 = arith.constant 0 : index
    %37 = vector.load %arg10[%c0_29, %c0_30, %c0_31] : memref<10x18x24xf32, #tpu.memory_space<vmem>>, vector<10x16x24xf32>
    %38 = vector.extract_strided_slice %35 {offsets = [0, 0], sizes = [1, 24], strides = [1, 1]} : vector<9x24xf32> to vector<1x24xf32>
    %39 = vector.shape_cast %38 : vector<1x24xf32> to vector<24xf32>
    %40 = vector.shape_cast %39 : vector<24xf32> to vector<1x1x24xf32>
    %41 = vector.extract_strided_slice %37 {offsets = [0, 0, 0], sizes = [8, 16, 24], strides = [1, 1, 1]} : vector<10x16x24xf32> to vector<8x16x24xf32>
    %42 = vector.broadcast %40 : vector<1x1x24xf32> to vector<8x16x24xf32>
    %43 = arith.mulf %41, %42 : vector<8x16x24xf32>
    %44 = arith.addf %36, %43 : vector<8x16x24xf32>
    %45 = vector.extract_strided_slice %35 {offsets = [3, 0], sizes = [1, 24], strides = [1, 1]} : vector<9x24xf32> to vector<1x24xf32>
    %46 = vector.shape_cast %45 : vector<1x24xf32> to vector<24xf32>
    %47 = vector.shape_cast %46 : vector<24xf32> to vector<1x1x24xf32>
    %48 = vector.extract_strided_slice %37 {offsets = [1, 0, 0], sizes = [8, 16, 24], strides = [1, 1, 1]} : vector<10x16x24xf32> to vector<8x16x24xf32>
    %49 = vector.broadcast %47 : vector<1x1x24xf32> to vector<8x16x24xf32>
    %50 = arith.mulf %48, %49 : vector<8x16x24xf32>
    %51 = arith.addf %44, %50 : vector<8x16x24xf32>
    %52 = vector.extract_strided_slice %35 {offsets = [6, 0], sizes = [1, 24], strides = [1, 1]} : vector<9x24xf32> to vector<1x24xf32>
    %53 = vector.shape_cast %52 : vector<1x24xf32> to vector<24xf32>
    %54 = vector.shape_cast %53 : vector<24xf32> to vector<1x1x24xf32>
    %55 = vector.extract_strided_slice %37 {offsets = [2, 0, 0], sizes = [8, 16, 24], strides = [1, 1, 1]} : vector<10x16x24xf32> to vector<8x16x24xf32>
    %56 = vector.broadcast %54 : vector<1x1x24xf32> to vector<8x16x24xf32>
    %57 = arith.mulf %55, %56 : vector<8x16x24xf32>
    %58 = arith.addf %51, %57 : vector<8x16x24xf32>
    %c0_32 = arith.constant 0 : index
    %c1_33 = arith.constant 1 : index
    %c0_34 = arith.constant 0 : index
    %59 = vector.load %arg10[%c0_32, %c1_33, %c0_34] : memref<10x18x24xf32, #tpu.memory_space<vmem>>, vector<10x16x24xf32>
    %60 = vector.extract_strided_slice %35 {offsets = [1, 0], sizes = [1, 24], strides = [1, 1]} : vector<9x24xf32> to vector<1x24xf32>
    %61 = vector.shape_cast %60 : vector<1x24xf32> to vector<24xf32>
    %62 = vector.shape_cast %61 : vector<24xf32> to vector<1x1x24xf32>
    %63 = vector.extract_strided_slice %59 {offsets = [0, 0, 0], sizes = [8, 16, 24], strides = [1, 1, 1]} : vector<10x16x24xf32> to vector<8x16x24xf32>
    %64 = vector.broadcast %62 : vector<1x1x24xf32> to vector<8x16x24xf32>
    %65 = arith.mulf %63, %64 : vector<8x16x24xf32>
    %66 = arith.addf %58, %65 : vector<8x16x24xf32>
    %67 = vector.extract_strided_slice %35 {offsets = [4, 0], sizes = [1, 24], strides = [1, 1]} : vector<9x24xf32> to vector<1x24xf32>
    %68 = vector.shape_cast %67 : vector<1x24xf32> to vector<24xf32>
    %69 = vector.shape_cast %68 : vector<24xf32> to vector<1x1x24xf32>
    %70 = vector.extract_strided_slice %59 {offsets = [1, 0, 0], sizes = [8, 16, 24], strides = [1, 1, 1]} : vector<10x16x24xf32> to vector<8x16x24xf32>
    %71 = vector.broadcast %69 : vector<1x1x24xf32> to vector<8x16x24xf32>
    %72 = arith.mulf %70, %71 : vector<8x16x24xf32>
    %73 = arith.addf %66, %72 : vector<8x16x24xf32>
    %74 = vector.extract_strided_slice %35 {offsets = [7, 0], sizes = [1, 24], strides = [1, 1]} : vector<9x24xf32> to vector<1x24xf32>
    %75 = vector.shape_cast %74 : vector<1x24xf32> to vector<24xf32>
    %76 = vector.shape_cast %75 : vector<24xf32> to vector<1x1x24xf32>
    %77 = vector.extract_strided_slice %59 {offsets = [2, 0, 0], sizes = [8, 16, 24], strides = [1, 1, 1]} : vector<10x16x24xf32> to vector<8x16x24xf32>
    %78 = vector.broadcast %76 : vector<1x1x24xf32> to vector<8x16x24xf32>
    %79 = arith.mulf %77, %78 : vector<8x16x24xf32>
    %80 = arith.addf %73, %79 : vector<8x16x24xf32>
    %c0_35 = arith.constant 0 : index
    %c2 = arith.constant 2 : index
    %c0_36 = arith.constant 0 : index
    %81 = vector.load %arg10[%c0_35, %c2, %c0_36] : memref<10x18x24xf32, #tpu.memory_space<vmem>>, vector<10x16x24xf32>
    %82 = vector.extract_strided_slice %35 {offsets = [2, 0], sizes = [1, 24], strides = [1, 1]} : vector<9x24xf32> to vector<1x24xf32>
    %83 = vector.shape_cast %82 : vector<1x24xf32> to vector<24xf32>
    %84 = vector.shape_cast %83 : vector<24xf32> to vector<1x1x24xf32>
    %85 = vector.extract_strided_slice %81 {offsets = [0, 0, 0], sizes = [8, 16, 24], strides = [1, 1, 1]} : vector<10x16x24xf32> to vector<8x16x24xf32>
    %86 = vector.broadcast %84 : vector<1x1x24xf32> to vector<8x16x24xf32>
    %87 = arith.mulf %85, %86 : vector<8x16x24xf32>
    %88 = arith.addf %80, %87 : vector<8x16x24xf32>
    %89 = vector.extract_strided_slice %35 {offsets = [5, 0], sizes = [1, 24], strides = [1, 1]} : vector<9x24xf32> to vector<1x24xf32>
    %90 = vector.shape_cast %89 : vector<1x24xf32> to vector<24xf32>
    %91 = vector.shape_cast %90 : vector<24xf32> to vector<1x1x24xf32>
    %92 = vector.extract_strided_slice %81 {offsets = [1, 0, 0], sizes = [8, 16, 24], strides = [1, 1, 1]} : vector<10x16x24xf32> to vector<8x16x24xf32>
    %93 = vector.broadcast %91 : vector<1x1x24xf32> to vector<8x16x24xf32>
    %94 = arith.mulf %92, %93 : vector<8x16x24xf32>
    %95 = arith.addf %88, %94 : vector<8x16x24xf32>
    %96 = vector.extract_strided_slice %35 {offsets = [8, 0], sizes = [1, 24], strides = [1, 1]} : vector<9x24xf32> to vector<1x24xf32>
    %97 = vector.shape_cast %96 : vector<1x24xf32> to vector<24xf32>
    %98 = vector.shape_cast %97 : vector<24xf32> to vector<1x1x24xf32>
    %99 = vector.extract_strided_slice %81 {offsets = [2, 0, 0], sizes = [8, 16, 24], strides = [1, 1, 1]} : vector<10x16x24xf32> to vector<8x16x24xf32>
    %100 = vector.broadcast %98 : vector<1x1x24xf32> to vector<8x16x24xf32>
    %101 = arith.mulf %99, %100 : vector<8x16x24xf32>
    %102 = arith.addf %95, %101 : vector<8x16x24xf32>
    %c0_37 = arith.constant 0 : index
    %c0_38 = arith.constant 0 : index
    %103 = vector.load %arg6[%c0_37, %c0_38] : memref<1x24xf32, #tpu.memory_space<vmem>>, vector<1x24xf32>
    %104 = vector.shape_cast %103 : vector<1x24xf32> to vector<1x1x24xf32>
    %105 = vector.broadcast %104 : vector<1x1x24xf32> to vector<8x16x24xf32>
    %106 = arith.addf %102, %105 : vector<8x16x24xf32>
    %cst_39 = arith.constant 0.000000e+00 : f32
    %cst_40 = arith.constant 6.000000e+00 : f32
    %107 = vector.broadcast %cst_39 : f32 to vector<8x16x24xf32>
    %108 = arith.maximumf %107, %106 : vector<8x16x24xf32>
    %109 = vector.broadcast %cst_40 : f32 to vector<8x16x24xf32>
    %110 = arith.minimumf %109, %108 : vector<8x16x24xf32>
    %111 = vector.shape_cast %110 : vector<8x16x24xf32> to vector<128x24xf32>
    %112 = arith.truncf %111 : vector<128x24xf32> to vector<128x24xbf16>
    %c0_41 = arith.constant 0 : index
    %c0_42 = arith.constant 0 : index
    %113 = vector.load %arg7[%c0_41, %c0_42] : memref<24x4xbf16, #tpu.memory_space<vmem>>, vector<24x4xbf16>
    %cst_43 = arith.constant dense<0.000000e+00> : vector<128x4xf32>
    %114 = tpu.matmul %112, %113, %cst_43 {dimension_numbers = #tpu.dot_dimension_numbers<[1], [0], [0], [1], [0, 0, 1, 1], [], []>} : vector<128x24xbf16>, vector<24x4xbf16>, vector<128x4xf32> -> vector<128x4xf32>
    %c0_44 = arith.constant 0 : index
    %c0_45 = arith.constant 0 : index
    %115 = vector.load %arg8[%c0_44, %c0_45] : memref<1x4xf32, #tpu.memory_space<vmem>>, vector<1x4xf32>
    %116 = vector.broadcast %115 : vector<1x4xf32> to vector<128x4xf32>
    %117 = arith.addf %114, %116 : vector<128x4xf32>
    %118 = vector.extract_strided_slice %4 {offsets = [1, 0, 0], sizes = [8, 16, 4], strides = [1, 1, 1]} : vector<10x16x4xf32> to vector<8x16x4xf32>
    %119 = vector.shape_cast %118 : vector<8x16x4xf32> to vector<128x4xf32>
    %120 = arith.addf %117, %119 : vector<128x4xf32>
    %121 = vector.shape_cast %120 : vector<128x4xf32> to vector<8x16x4xf32>
    %c0_46 = arith.constant 0 : index
    %c0_47 = arith.constant 0 : index
    %c0_48 = arith.constant 0 : index
    %c0_49 = arith.constant 0 : index
    %122 = vector.load %arg9[%c0_46, %c0_47, %c0_48, %c0_49] : memref<1x8x16x4xf32, #tpu.memory_space<vmem>>, vector<1x8x16x4xf32>
    %123 = vector.shape_cast %122 : vector<1x8x16x4xf32> to vector<8x16x4xf32>
    %124 = vector.shape_cast %121 : vector<8x16x4xf32> to vector<1x8x16x4xf32>
    tpu.vector_store %arg9[%c0_46, %c0_47, %c0_48, %c0_49], %124 {strides = array<i32>} : memref<1x8x16x4xf32, #tpu.memory_space<vmem>>, vector<1x8x16x4xf32>,
    return
  }
  func.func @transform_0(%arg0: i32, %arg1: i32) -> (i32, i32, i32, i32) {
    %c0_i32 = arith.constant 0 : i32
    %c0_i32_0 = arith.constant 0 : i32
    %c0_i32_1 = arith.constant 0 : i32
    %c0_i32_2 = arith.constant 0 : i32
    return %arg0, %c0_i32, %c0_i32_0, %c0_i32_1 : i32, i32, i32, i32
  }
  func.func @transform_1(%arg0: i32, %arg1: i32) -> (i32, i32) {
    %c0_i32 = arith.constant 0 : i32
    %c0_i32_0 = arith.constant 0 : i32
    %c0_i32_1 = arith.constant 0 : i32
    return %c0_i32, %c0_i32_0 : i32, i32
  }
  func.func @transform_2(%arg0: i32, %arg1: i32) -> (i32, i32) {
    %c0_i32 = arith.constant 0 : i32
    %c0_i32_0 = arith.constant 0 : i32
    %c0_i32_1 = arith.constant 0 : i32
    return %c0_i32, %c0_i32_0 : i32, i32
  }
  func.func @transform_3(%arg0: i32, %arg1: i32) -> (i32, i32) {
    %c0_i32 = arith.constant 0 : i32
    %c0_i32_0 = arith.constant 0 : i32
    %c0_i32_1 = arith.constant 0 : i32
    return %c0_i32, %c0_i32_0 : i32, i32
  }
  func.func @transform_4(%arg0: i32, %arg1: i32) -> (i32, i32) {
    %c0_i32 = arith.constant 0 : i32
    %c0_i32_0 = arith.constant 0 : i32
    %c0_i32_1 = arith.constant 0 : i32
    return %c0_i32, %c0_i32_0 : i32, i32
  }
  func.func @transform_5(%arg0: i32, %arg1: i32) -> (i32, i32) {
    %c0_i32 = arith.constant 0 : i32
    %c0_i32_0 = arith.constant 0 : i32
    %c0_i32_1 = arith.constant 0 : i32
    return %c0_i32, %c0_i32_0 : i32, i32
  }
  func.func @transform_6(%arg0: i32, %arg1: i32) -> (i32, i32) {
    %c0_i32 = arith.constant 0 : i32
    %c0_i32_0 = arith.constant 0 : i32
    %c0_i32_1 = arith.constant 0 : i32
    return %c0_i32, %c0_i32_0 : i32, i32
  }
  func.func @transform_7(%arg0: i32, %arg1: i32) -> (i32, i32, i32, i32) {
    %c0_i32 = arith.constant 0 : i32
    %c0_i32_0 = arith.constant 0 : i32
    %c0_i32_1 = arith.constant 0 : i32
    return %arg0, %arg1, %c0_i32, %c0_i32_0 : i32, i32, i32, i32
  }
}

</mosaic_0001>

<bundles_post_ra>
// kernel: tpu_custom_call.1
= control target key start
LH: loop header
LB: loop body
LE: loop exit
PB: predicated region body
PF: predicated region fallthrough
CT: control target
= control target key end

     0   :  { %s1551_s24 = smov 0   ;;  %s1553_s25 = smov 0   ;;  %s2209_s0 = inlined_call_operand.vmem [shape: f32[2,18,16,4], index: 0, kind: input, shape index: {}]   ;;  %s2210_s1 = inlined_call_operand.vmem [shape: bf16[4,24], index: 1, kind: input, shape index: {}]   ;;  %s2211_s2 = inlined_call_operand.vmem [shape: f32[1,24], index: 2, kind: input, shape index: {}]   ;;  %s2212_s3 = inlined_call_operand.vmem [shape: f32[9,24], index: 3, kind: input, shape index: {}]   ;;  %s2213_s4 = inlined_call_operand.vmem [shape: f32[1,24], index: 4, kind: input, shape index: {}]   ;;  %s2214_s5 = inlined_call_operand.vmem [shape: bf16[24,4], index: 5, kind: input, shape index: {}]   ;;  %s2215_s6 = inlined_call_operand.vmem [shape: f32[1,4], index: 6, kind: input, shape index: {}]   ;;  %s2216_s7 = inlined_call_operand.vmem [shape: f32[2,16,16,4], index: 7, kind: output, shape index: {}]  }
   0x1   :  { %s1555_s26 = smov 0   ;;  %s1557_s27 = smov 0  }
   0x2   :  { %s1559_s28 = smov 0  }
   0x3 LB: > { %s26_s29 = sadd.s32 1, %s1500_s26  ;;  %s29_s30 = sadd.s32 1, %s1504_s27  ;;  %s1508_s28 = sphi %s1559_s28, %s17_s28   ;;  %s1504_s27 = sphi %s1557_s27, %s2221_s27   ;;  %s1500_s26 = sphi %s1555_s26, %s2220_s26   ;;  %s1496_s25 = sphi %s1553_s25, %s2219_s25   ;;  %s1492_s24 = sphi %s1551_s24, %s2218_s24  }
   0x4   : > { %p27_p0 = scmp.ge.s32.totalorder %s26_s29, 2  ;;  %p1310_p1 = scmp.ge.s32.totalorder %s1508_s28, 1 }
   0x5   : > { %p251_p2 = scmp.lt.s32.totalorder %s1508_s28, 5 }
   0x6   : > { %s2223_s29 = smov (%p27_p0, %s26_s29), 0  ;;  %s2225_s30 = smov (!%p27_p0, %s29_s30), %s1504_s27 }
   0x7   : > { %p252_p3 = pnand %p1310_p1, %p251_p2  ;;  %p31_p4 = scmp.ge.s32.totalorder %s2225_s30, 2 }
   0x8   : > { %p288_p5 = scmp.lt.s32.totalorder (!%p252_p3), %s1496_s25, 1  ;;  %s1344_s11 = sshll.u32 (!%p252_p3), %s1492_s24, 7 }
   0x9   : > { %s2227_s30 = smov (%p31_p4, %s2225_s30), 0  ;;  %255 = sbr.rel (%p252_p3) target bundleno = 541 (0x21d), region = 48 }
   0xa   : > { %s1652_s20 = sshll.u32 (!%p252_p3), %s1492_s24, 3 }
   0xb   : > { %p534_p6 = scmp.gt.s32.totalorder (!%p252_p3), %s1652_s20, 0  ;;  %s536_s24 = sadd.s32 (!%p252_p3), 8, %s1652_s20 }
   0xc   : > { %p1669_p7 = scmp.lt.s32.totalorder (!%p252_p3), %s536_s24, 16  ;;  %p296_p8 = scmp.lt.s32.totalorder (!%p252_p3), %s1652_s20, 15 }
   0xe   : > { %v338_v0 = vld [vmem:[%s2210_s1] sm:$0x3]  ;;  %vm377_vm0 = vcmask 1041408   ;;  %s2229_s25 = smov (!%p288_p5, %s1496_s25), 1  ;;  %vm346_vm1 = vcmask 31744   ;;  %vm539_vm2 = vcmask 188416   ;;  %v611_v40 = vlaneseq }
   0xf   : > { %1408 = vmatprep.subr.msk.bf16.mxu0 %vm377_vm0, %v338_v0  ;;  %v379_v1 = vsel %vm377_vm0, %v338_v0, 0  ;;  %s1410_s10 = smul.u32 288, %s2229_s25  ;;  %v1510_v32 = vmov 0.0   ;;  %v1452_v33 = vld [vmem:[%s2214_s5 + $0x8] ss:$0 sps:$4 sm:$0xff]   ;;  %vm1081_vm3 = vcmask 1043456  }
  0x10   : > { %1367 = vmatpush3.bf16.msra.mxu0 %v379_v1  ;;  %540 = vst.msk [vmem:[#allocation2] sm:$0x1] %vm539_vm2, %v1510_v32  ;;  %541 = vst.msk [vmem:[#allocation2 + $0x18] sm:$0x1] %vm539_vm2, %v1510_v32  ;;  %v1453_v34 = vld [vmem:[%s2214_s5] sm:$0xff]   ;;  %1409 = vmatprep.subr.msk.bf16.mxu1 %vm1081_vm3, %v1452_v33  ;;  %v1083_v35 = vsel %vm1081_vm3, %v1452_v33, 0 }
  0x11   : > { %s292_s14 = scalar_lea.vmem %s2209_s0, %s1410_s10  ;;  %542 = vst.msk [vmem:[#allocation2 + $0x30] sm:$0x1] %vm539_vm2, %v1510_v32  ;;  %543 = vst.msk [vmem:[#allocation2 + $0x48] sm:$0x1] %vm539_vm2, %v1510_v32  ;;  %1389 = vmatpush3.bf16.msra.mxu1 %v1083_v35  ;;  %v1657_v36 = vld [vmem:[%s2211_s2] ss:$0 sm:$0xff] }
  0x12   : > { %s1593_s15 = scalar_lea.vmem %s292_s14, %s1344_s11  ;;  %544 = vst.msk [vmem:[#allocation2 + $0x60] sm:$0x1] %vm539_vm2, %v1510_v32  ;;  %550 = vst.msk [vmem:[#allocation2 + $0x11] sm:$0x1] %vm539_vm2, %v1510_v32  ;;  %1390 = vmatprep.subr.bf16.mxu1 %v1453_v34  ;;  %vm561_vm4 = vcmask 195584   ;;  %v612_v49 = vshrl.u32 %v611_v40, 7 }
  0x13   : > { %v308_v2 = vld [vmem:[%s1593_s15] sm:$0xff]  ;;  %v309_v3 = vld [vmem:[%s1593_s15 + $0x8] sm:$0xff]  ;;  %v310_v4 = vld [vmem:[%s1593_s15 + $0x10] sm:$0xff]  ;;  %551 = vst.msk [vmem:[#allocation2 + $0x29] sm:$0x1] %vm539_vm2, %v1510_v32  ;;  %s2231_s20 = smov (!%p296_p8, %s1652_s20), 15 }
  0x14   : > { %v328_v5 = vpack.c.bf16 %v309_v3, %v308_v2  ;;  %v311_v6 = vld [vmem:[%s1593_s15 + $0x18] sm:$0xff]  ;;  %v312_v7 = vld [vmem:[%s1593_s15 + $0x20] sm:$0xff]  ;;  %v313_v8 = vld [vmem:[%s1593_s15 + $0x28] sm:$0xff]  ;;  %552 = vst.msk [vmem:[#allocation2 + $0x41] sm:$0x1] %vm539_vm2, %v1510_v32  ;;  %v613_v59 = vsub.s32 0, %v612_v49 }
  0x15   : > { %v329_v9 = vpack.c.bf16 %v311_v6, %v310_v4  ;;  %v330_v10 = vpack.c.bf16 %v313_v8, %v312_v7  ;;  %v314_v11 = vld [vmem:[%s1593_s15 + $0x30] sm:$0xff]  ;;  %v315_v12 = vld [vmem:[%s1593_s15 + $0x38] sm:$0xff]  ;;  %v316_v13 = vld [vmem:[%s1593_s15 + $0x40] sm:$0xff]  ;;  %545 = vst.msk [vmem:[#allocation2 + $0x78] sm:$0x1] %vm539_vm2, %v1510_v32  ;;  %1391 = vmatpush3.bf16.msra.mxu1 %v1453_v34  ;;  %v649_v60 = vsub.s32 3, %v612_v49 }
  0x16   : > { %1368 = vmatprep.mubr.msk.bf16.mxu0 %vm346_vm1, %v328_v5  ;;  %v317_v14 = vld [vmem:[%s1593_s15 + $0x48] sm:$0xff]  ;;  %v331_v15 = vpack.c.bf16 %v315_v12, %v314_v11  ;;  %v318_v17 = vld [vmem:[%s1593_s15 + $0x50] sm:$0xff]  ;;  %v319_v18 = vld [vmem:[%s1593_s15 + $0x58] sm:$0xff]  ;;  %546 = vst.msk [vmem:[#allocation2 + $0x90] sm:$0x1] %vm539_vm2, %v1510_v32  ;;  %v741_v61 = vsub.s32 1, %v612_v49 }
  0x17   : > { %1369 = vmatmul.mubr.msk.bf16.vlgmr.msra.gmra.mxu0 %vm346_vm1, %v329_v9  ;;  %v332_v16 = vpack.c.bf16 %v317_v14, %v316_v13  ;;  %v320_v19 = vld [vmem:[%s1593_s15 + $0x60] sm:$0xff]  ;;  %v321_v20 = vld [vmem:[%s1593_s15 + $0x68] sm:$0xff]  ;;  %v333_v21 = vpack.c.bf16 %v319_v18, %v318_v17  ;;  %v322_v23 = vld [vmem:[%s1593_s15 + $0x70] sm:$0xff]  ;;  %547 = vst.msk [vmem:[#allocation2 + $0xa8] sm:$0x1] %vm539_vm2, %v1510_v32  ;;  %v777_v62 = vsub.s32 4, %v612_v49 }
  0x18   : > { %1372 = vmatprep.mubr.msk.bf16.mxu0 %vm346_vm1, %v330_v10  ;;  %v334_v22 = vpack.c.bf16 %v321_v20, %v320_v19  ;;  %v323_v24 = vld [vmem:[%s1593_s15 + $0x78] sm:$0xff]  ;;  %v324_v25 = vld [vmem:[%s1593_s15 + $0x80] sm:$0xff]  ;;  %v325_v26 = vld [vmem:[%s1593_s15 + $0x88] sm:$0xff]  ;;  %548 = vst.msk [vmem:[#allocation2 + $0xc0] sm:$0x1] %vm539_vm2, %v1510_v32  ;;  %v685_v4 = vsub.s32 6, %v612_v49 }
  0x19   : > { %v335_v27 = vpack.c.bf16 %v323_v24, %v322_v23  ;;  %v336_v28 = vpack.c.bf16 %v325_v26, %v324_v25  ;;  %v326_v29 = vld [vmem:[%s1593_s15 + $0x90] sm:$0xff]  ;;  %v327_v30 = vld [vmem:[%s1593_s15 + $0x98] sm:$0xff]  ;;  %549 = vst.msk [vmem:[#allocation2 + $0xd8] sm:$0x1] %vm539_vm2, %v1510_v32  ;;  %553 = vst.msk [vmem:[#allocation2 + $0x59] sm:$0x1] %vm539_vm2, %v1510_v32 }
  0x1a   : > { %v337_v31 = vpack.c.bf16 %v327_v30, %v326_v29  ;;  %554 = vst.msk [vmem:[#allocation2 + $0x71] sm:$0x1] %vm539_vm2, %v1510_v32  ;;  %555 = vst.msk [vmem:[#allocation2 + $0x89] sm:$0x1] %vm539_vm2, %v1510_v32  ;;  %s1661_s23 = scalar_select %p534_p6, 1.0, 0.0 }
  0x1b   : > { %556 = vst.msk [vmem:[#allocation2 + $0xa1] sm:$0x1] %vm539_vm2, %v1510_v32  ;;  %557 = vst.msk [vmem:[#allocation2 + $0xb9] sm:$0x1] %vm539_vm2, %v1510_v32  ;;  %v589_v2 = vld [vmem:[%s2212_s3] sm:$0xff]  ;;  %v813_v5 = vsub.s32 7, %v612_v49 }
  0x1c   : > { %558 = vst.msk [vmem:[#allocation2 + $0xd1] sm:$0x1] %vm539_vm2, %v1510_v32  ;;  %559 = vst.msk [vmem:[#allocation2 + $0xe9] sm:$0x1] %vm539_vm2, %v1510_v32  ;;  %v578_v47 = vstv %s1661_s23  ;;  %s538_s11 = scalar_select %p1669_p7, 1.0, 0.0  ;;  %v1683_v13 = vrot.slane %v589_v2, %v613_v59  ;;  %v1685_v14 = vrot.slane %v589_v2, %v649_v60  ;;  %v1696_v24 = vrot.slane %v589_v2, %v685_v4 }
  0x1d   : > { %v869_v6 = vsub.s32 2, %v612_v49  ;;  %v905_v7 = vsub.s32 5, %v612_v49  ;;  %v1698_v25 = vrot.slane %v589_v2, %v813_v5  ;;  %s1313_s17 = sshll.u32 %s2231_s20, 1  ;;  %s1314_s18 = sshll.u32 %s2229_s25, 5 }
  0x1e   : > { %v1694_v23 = vstv %s538_s11  ;;  %s300_s19 = sadd.s32 %s1314_s18, %s1313_s17 }
  0x1f   : > { %1373 = vmatmul.mubr.msk.bf16.gmra.mxu0 %vm346_vm1, %v331_v15  ;;  %v1687_v15 = vrot.slane %v589_v2, %v741_v61  ;;  %v1700_v26 = vrot.slane %v589_v2, %v869_v6  ;;  %v1704_v30 = vrot.slane %v589_v2, %v905_v7  ;;  %s1315_s23 = sshll.u32 %s300_s19, 3 }
  0x20   : > { %1376 = vmatprep.mubr.msk.bf16.mxu0 %vm346_vm1, %v332_v16  ;;  %v1689_v16 = vrot.slane %v589_v2, %v777_v62  ;;  %s2129_s9 = scalar_lea.vmem %s2216_s7, %s1315_s23 }
  0x27   : > { %1377 = vmatmul.mubr.msk.bf16.gmra.mxu0 %vm346_vm1, %v333_v21 }
  0x28   : > { %1380 = vmatprep.mubr.msk.bf16.mxu0 %vm346_vm1, %v334_v22 }
  0x2f   : > { %1381 = vmatmul.mubr.msk.bf16.gmra.mxu0 %vm346_vm1, %v335_v27 }
  0x30   : > { %1384 = vmatprep.mubr.msk.bf16.mxu0 %vm346_vm1, %v336_v28 }
  0x37   : > { %1385 = vmatmul.mubr.msk.bf16.gmra.mxu0 %vm346_vm1, %v337_v31 }
  0xd7   : > { %v1370_v37 = vpop.f32.mrf.mxu0 }
  0xd8   : > { %v424_v38 = vadd.f32 %v1370_v37, %v1657_v36 }
  0xd9   : > { %v415_v39 = vpop.f32.mrf.mxu0 }
  0xda   : > { %v496_v41 = vmax.f32 %v424_v38, 0.0  ;;  %v416_v42 = vadd.f32 %v1657_v36, %v415_v39 }
  0xdb   : > { %v1371_v43 = vpop.f32.mrf.mxu0 }
  0xdc   : > { %v516_v44 = vmin.f32 %v496_v41, 6.0  ;;  %v494_v45 = vmax.f32 %v416_v42, 0.0  ;;  %v427_v46 = vadd.f32 %v1371_v43, %v1657_v36 }
  0xdd   : > { %v418_v48 = vpop.f32.mrf.mxu0 }
  0xde   : > { %562 = vst.msk [vmem:[#allocation2 + $0x19] sm:$0xff] %vm561_vm4, %v516_v44  ;;  %v514_v50 = vmin.f32 %v494_v45, 6.0  ;;  %v497_v51 = vmax.f32 %v427_v46, 0.0  ;;  %v419_v52 = vadd.f32 %v1657_v36, %v418_v48 }
  0xdf   : > { %v1374_v53 = vpop.f32.mrf.mxu0 }
  0xe0   : > { %v579_v54 = vmul.f32 %v578_v47, %v514_v50  ;;  %v517_v55 = vmin.f32 %v497_v51, 6.0  ;;  %v495_v56 = vmax.f32 %v419_v52, 0.0  ;;  %v440_v57 = vadd.f32 %v1374_v53, %v1657_v36 }
  0xe1   : > { %v431_v58 = vpop.f32.mrf.mxu0 }
  0xe2   : > { %581 = vst.msk [vmem:[#allocation2 + $0x1] sm:$0xff] %vm561_vm4, %v579_v54  ;;  %563 = vst.msk [vmem:[#allocation2 + $0x21] sm:$0xff] %vm561_vm4, %v517_v55  ;;  %v515_v63 = vmin.f32 %v495_v56, 6.0  ;;  %v500_v0 = vmax.f32 %v440_v57, 0.0  ;;  %v432_v1 = vadd.f32 %v1657_v36, %v431_v58 }
  0xe3   : > { %v1375_v3 = vpop.f32.mrf.mxu0 }
  0xe4   : > { %v580_v8 = vmul.f32 %v578_v47, %v515_v63  ;;  %v520_v9 = vmin.f32 %v500_v0, 6.0  ;;  %v498_v10 = vmax.f32 %v432_v1, 0.0  ;;  %v443_v11 = vadd.f32 %v1375_v3, %v1657_v36 }
  0xe5   : > { %v434_v12 = vpop.f32.mrf.mxu0  ;;  %v593_v20 = vld [vmem:[#allocation2 + $0x18] sm:$0xff] }
  0xe6   : > { %582 = vst.msk [vmem:[#allocation2 + $0x9] sm:$0xff] %vm561_vm4, %v580_v8  ;;  %566 = vst.msk [vmem:[#allocation2 + $0x49] sm:$0xff] %vm561_vm4, %v520_v9  ;;  %v518_v17 = vmin.f32 %v498_v10, 6.0  ;;  %v501_v18 = vmax.f32 %v443_v11, 0.0  ;;  %v435_v19 = vadd.f32 %v1657_v36, %v434_v12  ;;  %v721_v21 = vld [vmem:[#allocation2 + $0x19] sm:$0xff]  ;;  %v617_v34 = vmul.f32 %v1683_v13, %v593_v20 }
  0xe7   : > { %v1378_v22 = vpop.f32.mrf.mxu0  ;;  %v651_v35 = vmul.f32 %v1685_v14, %v593_v20  ;;  %v1709_v38 = vmul.f32 %v1687_v15, %v721_v21  ;;  %v1712_v39 = vmul.f32 %v1689_v16, %v721_v21 }
  0xe8   : > { %564 = vst.msk [vmem:[#allocation2 + $0x31] sm:$0xff] %vm561_vm4, %v518_v17  ;;  %v521_v27 = vmin.f32 %v501_v18, 6.0  ;;  %v499_v28 = vmax.f32 %v435_v19, 0.0  ;;  %v456_v29 = vadd.f32 %v1378_v22, %v1657_v36 }
  0xe9   : > { %v447_v31 = vpop.f32.mrf.mxu0  ;;  %v591_v32 = vld [vmem:[#allocation2] sm:$0xff] }
  0xea   : > { %v594_v33 = vld [vmem:[#allocation2 + $0x20] sm:$0xff]  ;;  %567 = vst.msk [vmem:[#allocation2 + $0x51] sm:$0xff] %vm561_vm4, %v521_v27  ;;  %v519_v40 = vmin.f32 %v499_v28, 6.0  ;;  %v504_v41 = vmax.f32 %v456_v29, 0.0  ;;  %v448_v42 = vadd.f32 %v1657_v36, %v447_v31  ;;  %v615_v43 = vmul.f32 %v1683_v13, %v591_v32 }
  0xeb   : > { %v719_v37 = vld [vmem:[#allocation2 + $0x1] sm:$0xff]  ;;  %v1379_v47 = vpop.f32.mrf.mxu0  ;;  %v1720_v48 = vmul.f32 %v1683_v13, %v594_v33  ;;  %v652_v49 = vmul.f32 %v1685_v14, %v594_v33 }
  0xec   : > { %v722_v44 = vld [vmem:[#allocation2 + $0x21] sm:$0xff]  ;;  %v1724_v50 = vmul.f32 %v1687_v15, %v719_v37  ;;  %565 = vst.msk [vmem:[#allocation2 + $0x39] sm:$0xff] %vm561_vm4, %v519_v40  ;;  %v524_v52 = vmin.f32 %v504_v41, 6.0  ;;  %v502_v53 = vmax.f32 %v448_v42, 0.0  ;;  %v459_v54 = vadd.f32 %v1379_v47, %v1657_v36 }
  0xed   : > { %v849_v45 = vld [vmem:[#allocation2 + $0x1a] sm:$0xff]  ;;  %v1717_v46 = vld [vmem:[#allocation2 + $0x22] sm:$0xff]  ;;  %v1727_v51 = vmul.f32 %v1687_v15, %v722_v44  ;;  %v667_v55 = vadd.f32 %v651_v35, %v615_v43  ;;  %v450_v56 = vpop.f32.mrf.mxu0  ;;  %v1734_v60 = vmul.f32 %v1689_v16, %v722_v44 }
  0xee   : > { %v592_v57 = vld [vmem:[#allocation2 + $0x8] sm:$0xff]  ;;  %v1737_v61 = vmul.f32 %v1700_v26, %v849_v45  ;;  %v1741_v62 = vmul.f32 %v1700_v26, %v1717_v46  ;;  %v1744_v63 = vmul.f32 %v1704_v30, %v849_v45  ;;  %570 = vst.msk [vmem:[#allocation2 + $0x79] sm:$0xff] %vm561_vm4, %v524_v52  ;;  %v522_v0 = vmin.f32 %v502_v53, 6.0 }
  0xef   : > { %v1731_v58 = vld [vmem:[#allocation2 + $0x48] sm:$0xff]  ;;  %v505_v1 = vmax.f32 %v459_v54, 0.0  ;;  %v451_v2 = vadd.f32 %v1657_v36, %v450_v56  ;;  %v616_v3 = vmul.f32 %v1683_v13, %v592_v57  ;;  %v1382_v5 = vpop.f32.mrf.mxu0  ;;  %v595_v6 = vld [vmem:[#allocation2 + $0x30] sm:$0xff] }
  0xf0   : > { %v720_v59 = vld [vmem:[#allocation2 + $0x9] sm:$0xff]  ;;  %v655_v7 = vmul.f32 %v1685_v14, %v1731_v58  ;;  %v689_v8 = vmul.f32 %v1696_v24, %v1731_v58  ;;  %v1755_v9 = vld [vmem:[#allocation2 + $0x31] sm:$0xff]  ;;  %568 = vst.msk [vmem:[#allocation2 + $0x61] sm:$0xff] %vm561_vm4, %v522_v0  ;;  %v472_v18 = vadd.f32 %v1382_v5, %v1657_v36  ;;  %v619_v19 = vmul.f32 %v1683_v13, %v595_v6 }
  0xf1   : > { %v1749_v4 = vld [vmem:[#allocation2 + $0x49] sm:$0xff]  ;;  %v744_v10 = vmul.f32 %v1687_v15, %v720_v59  ;;  %v525_v12 = vmin.f32 %v505_v1, 6.0  ;;  %v503_v17 = vmax.f32 %v451_v2, 0.0  ;;  %v463_v20 = vpop.f32.mrf.mxu0  ;;  %v653_v22 = vmul.f32 %v1685_v14, %v595_v6  ;;  %v1784_v54 = vld [vmem:[#allocation2 + $0x51] sm:$0xff] }
  0xf2   : > { %v1760_v11 = vmul.f32 %v1687_v15, %v1749_v4  ;;  %v1765_v21 = vld [vmem:[#allocation2 + $0x50] sm:$0xff]  ;;  %v668_v27 = vadd.f32 %v652_v49, %v616_v3  ;;  %v687_v28 = vmul.f32 %v1696_v24, %v595_v6  ;;  %v1771_v29 = vmul.f32 %v1687_v15, %v1755_v9 }
  0xf3   : > { %571 = vst.msk [vmem:[#allocation2 + $0x81] sm:$0xff] %vm561_vm4, %v525_v12  ;;  %v523_v31 = vmin.f32 %v503_v17, 6.0  ;;  %v508_v32 = vmax.f32 %v472_v18, 0.0  ;;  %v464_v33 = vadd.f32 %v1657_v36, %v463_v20  ;;  %v656_v35 = vmul.f32 %v1685_v14, %v1765_v21  ;;  %v1383_v37 = vpop.f32.mrf.mxu0  ;;  %v596_v40 = vld [vmem:[#allocation2 + $0x38] sm:$0xff] }
  0xf4   : > { %v669_v41 = vadd.f32 %v653_v22, %v617_v34  ;;  %v671_v42 = vadd.f32 %v655_v7, %v619_v19  ;;  %v690_v43 = vmul.f32 %v1696_v24, %v1765_v21  ;;  %v703_v44 = vadd.f32 %v687_v28, %v667_v55  ;;  %v1779_v45 = vld [vmem:[#allocation2 + $0x39] sm:$0xff] }
  0xf5   : > { %569 = vst.msk [vmem:[#allocation2 + $0x69] sm:$0xff] %vm561_vm4, %v523_v31  ;;  %v528_v47 = vmin.f32 %v508_v32, 6.0  ;;  %v506_v49 = vmax.f32 %v464_v33, 0.0  ;;  %v475_v52 = vadd.f32 %v1383_v37, %v1657_v36  ;;  %v620_v53 = vmul.f32 %v1683_v13, %v596_v40  ;;  %v466_v56 = vpop.f32.mrf.mxu0 }
  0xf6   : > { %v654_v34 = vmul.f32 %v1685_v14, %v596_v40  ;;  %v688_v57 = vmul.f32 %v1696_v24, %v596_v40  ;;  %v705_v59 = vadd.f32 %v689_v8, %v669_v41  ;;  %v748_v55 = vmul.f32 %v1687_v15, %v1779_v45 }
  0xf7   : > { %574 = vst.msk [vmem:[#allocation2 + $0xa9] sm:$0xff] %vm561_vm4, %v528_v47  ;;  %v526_v0 = vmin.f32 %v506_v49, 6.0  ;;  %v509_v1 = vmax.f32 %v475_v52, 0.0  ;;  %v467_v2 = vadd.f32 %v1657_v36, %v466_v56  ;;  %v672_v3 = vadd.f32 %v656_v35, %v620_v53  ;;  %v1386_v5 = vpop.f32.mrf.mxu0  ;;  %v1792_v6 = vld [vmem:[#allocation2 + $0x60] sm:$0xff] }
  0xf8   : > { %v670_v7 = vadd.f32 %v654_v34, %v1720_v48  ;;  %v704_v12 = vadd.f32 %v688_v57, %v668_v27  ;;  %v1795_v17 = vld [vmem:[#allocation2 + $0x61] sm:$0xff]  ;;  %v1799_v8 = vmul.f32 %v1687_v15, %v1784_v54  ;;  %v759_v18 = vadd.f32 %v1724_v50, %v703_v44 }
  0xf9   : > { %572 = vst.msk [vmem:[#allocation2 + $0x91] sm:$0xff] %vm561_vm4, %v526_v0  ;;  %v529_v19 = vmin.f32 %v509_v1, 6.0  ;;  %v507_v20 = vmax.f32 %v467_v2, 0.0  ;;  %v488_v22 = vadd.f32 %v1386_v5, %v1657_v36  ;;  %v691_v28 = vmul.f32 %v1696_v24, %v1792_v6  ;;  %v479_v31 = vpop.f32.mrf.mxu0 }
  0xfa   : > { %v706_v48 = vadd.f32 %v690_v43, %v670_v7  ;;  %v1808_v27 = vmul.f32 %v1687_v15, %v1795_v17  ;;  %v760_v32 = vadd.f32 %v744_v10, %v704_v12  ;;  %v761_v33 = vadd.f32 %v1709_v38, %v705_v59 }
  0xfb   : > { %575 = vst.msk [vmem:[#allocation2 + $0xb1] sm:$0xff] %vm561_vm4, %v529_v19  ;;  %v527_v50 = vmin.f32 %v507_v20, 6.0  ;;  %v512_v35 = vmax.f32 %v488_v22, 0.0  ;;  %v480_v37 = vadd.f32 %v1657_v36, %v479_v31  ;;  %v707_v40 = vadd.f32 %v691_v28, %v671_v42  ;;  %v1387_v41 = vpop.f32.mrf.mxu0 }
  0xfc   : > { %v1813_v44 = vld [vmem:[#allocation2 + $0x68] sm:$0xff]  ;;  %v762_v43 = vadd.f32 %v1727_v51, %v706_v48  ;;  %v781_v49 = vmul.f32 %v1689_v16, %v1755_v9  ;;  %v782_v38 = vmul.f32 %v1689_v16, %v1779_v45  ;;  %v783_v10 = vmul.f32 %v1689_v16, %v1749_v4 }
  0xfd   : > { %v1815_v47 = vld [vmem:[#allocation2 + $0x69] sm:$0xff]  ;;  %573 = vst.msk [vmem:[#allocation2 + $0x99] sm:$0xff] %vm561_vm4, %v527_v50  ;;  %v532_v52 = vmin.f32 %v512_v35, 6.0  ;;  %v510_v42 = vmax.f32 %v480_v37, 0.0  ;;  %v491_v53 = vadd.f32 %v1387_v41, %v1657_v36  ;;  %v692_v56 = vmul.f32 %v1696_v24, %v1813_v44  ;;  %v482_v34 = vpop.f32.mrf.mxu0  ;;  %v852_v37 = vld [vmem:[#allocation2 + $0x3a] sm:$0xff] }
  0xfe   : > { %v1830_v51 = vmul.f32 %v1687_v15, %v1815_v47  ;;  %v763_v57 = vadd.f32 %v1771_v29, %v707_v40  ;;  %v784_v59 = vmul.f32 %v1689_v16, %v1784_v54  ;;  %v795_v0 = vadd.f32 %v1712_v39, %v759_v18 }
  0xff   : > { %v584_v1 = vmul.f32 %v1694_v23, %v532_v52  ;;  %v530_v2 = vmin.f32 %v510_v42, 6.0  ;;  %v513_v5 = vmax.f32 %v491_v53, 0.0  ;;  %v483_v7 = vadd.f32 %v1657_v36, %v482_v34  ;;  %v1864_v53 = vld [vmem:[%s2212_s3 + $0x8] ss:$0 sm:$0xff] }
 0x100   : > { %v708_v12 = vadd.f32 %v692_v56, %v672_v3  ;;  %v796_v19 = vadd.f32 %v1734_v60, %v760_v32  ;;  %v797_v20 = vadd.f32 %v781_v49, %v761_v33  ;;  %v798_v22 = vadd.f32 %v782_v38, %v762_v43  ;;  %v847_v3 = vld [vmem:[#allocation2 + $0x2] sm:$0xff]  ;;  %v848_v32 = vld [vmem:[#allocation2 + $0xa] sm:$0xff] }
 0x101   : > { %587 = vst.msk [vmem:[#allocation2 + $0xd9] sm:$0xff] %vm561_vm4, %v584_v1  ;;  %576 = vst.msk [vmem:[#allocation2 + $0xc1] sm:$0xff] %vm561_vm4, %v530_v2  ;;  %v533_v29 = vmin.f32 %v513_v5, 6.0  ;;  %v511_v28 = vmax.f32 %v483_v7, 0.0  ;;  %v799_v31 = vadd.f32 %v783_v10, %v763_v57  ;;  %v815_v39 = vmul.f32 %v1698_v25, %v1755_v9  ;;  %v1871_v1 = vld [vmem:[#allocation2 + $0x52] sm:$0xff] }
 0x102   : > { %v764_v18 = vadd.f32 %v748_v55, %v708_v12  ;;  %v816_v48 = vmul.f32 %v1698_v25, %v1779_v45  ;;  %v817_v36 = vmul.f32 %v1698_v25, %v1749_v4  ;;  %v818_v60 = vmul.f32 %v1698_v25, %v1784_v54  ;;  %v851_v55 = vld [vmem:[#allocation2 + $0x32] sm:$0xff] }
 0x103   : > { %v585_v33 = vmul.f32 %v1694_v23, %v533_v29  ;;  %v531_v50 = vmin.f32 %v511_v28, 6.0  ;;  %v819_v35 = vmul.f32 %v1698_v25, %v1795_v17  ;;  %v820_v9 = vmul.f32 %v1698_v25, %v1815_v47  ;;  %v1885_v29 = vld [vmem:[%s2213_s4] ss:$0 sm:$0xff] }
 0x104   : > { %v800_v45 = vadd.f32 %v784_v59, %v764_v18  ;;  %v831_v40 = vadd.f32 %v815_v39, %v795_v0  ;;  %v832_v41 = vadd.f32 %v816_v48, %v796_v19  ;;  %v833_v4 = vadd.f32 %v817_v36, %v797_v20  ;;  %v1869_v0 = vld [vmem:[#allocation2 + $0x4a] sm:$0xff] }
 0x105   : > { %588 = vst.msk [vmem:[#allocation2 + $0xe1] sm:$0xff] %vm561_vm4, %v585_v33  ;;  %577 = vst.msk [vmem:[#allocation2 + $0xc9] sm:$0xff] %vm561_vm4, %v531_v50  ;;  %v834_v54 = vadd.f32 %v818_v60, %v798_v22  ;;  %v835_v43 = vadd.f32 %v819_v35, %v799_v31  ;;  %v871_v23 = vmul.f32 %v1700_v26, %v847_v3  ;;  %v1878_v22 = vld [vmem:[#allocation2 + $0x62] sm:$0xff] }
 0x106   : > { %v872_v49 = vmul.f32 %v1700_v26, %v848_v32  ;;  %v836_v38 = vadd.f32 %v820_v9, %v800_v45  ;;  %v875_v10 = vmul.f32 %v1700_v26, %v851_v55  ;;  %v876_v52 = vmul.f32 %v1700_v26, %v852_v37 }
 0x107   : > { %v889_v42 = vadd.f32 %v1737_v61, %v833_v4  ;;  %v887_v56 = vadd.f32 %v871_v23, %v831_v40  ;;  %v890_v57 = vadd.f32 %v1741_v62, %v834_v54  ;;  %v908_v59 = vmul.f32 %v1704_v30, %v1717_v46  ;;  %v1880_v46 = vld [vmem:[#allocation2 + $0x6a] sm:$0xff] }
 0x108   : > { %v888_v34 = vadd.f32 %v872_v49, %v832_v41  ;;  %v891_v2 = vadd.f32 %v875_v10, %v835_v43  ;;  %v892_v5 = vadd.f32 %v876_v52, %v836_v38  ;;  %v909_v61 = vmul.f32 %v1704_v30, %v851_v55  ;;  %v1907_v52 = vld [vmem:[#allocation2 + $0x78] sm:$0xff] }
 0x109   : > { %v910_v7 = vmul.f32 %v1704_v30, %v852_v37  ;;  %v923_v12 = vadd.f32 %v1744_v63, %v887_v56  ;;  %v943_v20 = vmul.f32 %v1864_v53, %v851_v55  ;;  %v944_v62 = vmul.f32 %v1864_v53, %v852_v37 }
 0x10a   : > { %v924_v19 = vadd.f32 %v908_v59, %v888_v34  ;;  %v925_v28 = vadd.f32 %v909_v61, %v889_v42  ;;  %v945_v39 = vmul.f32 %v1864_v53, %v1869_v0  ;;  %v946_v63 = vmul.f32 %v1864_v53, %v1871_v1  ;;  %v1915_v59 = vld [vmem:[#allocation2 + $0x80] sm:$0xff] }
 0x10b   : > { %v926_v31 = vadd.f32 %v910_v7, %v890_v57  ;;  %v959_v18 = vadd.f32 %v943_v20, %v923_v12  ;;  %v911_v36 = vmul.f32 %v1704_v30, %v1869_v0  ;;  %v912_v60 = vmul.f32 %v1704_v30, %v1871_v1  ;;  %v1917_v12 = vld [vmem:[#allocation2 + $0x79] sm:$0xff] }
 0x10c   : > { %v960_v48 = vadd.f32 %v944_v62, %v924_v19  ;;  %v961_v3 = vadd.f32 %v945_v39, %v925_v28  ;;  %v947_v33 = vmul.f32 %v1864_v53, %v1878_v22  ;;  %v948_v50 = vmul.f32 %v1864_v53, %v1880_v46 }
 0x10d   : > { %v962_v32 = vadd.f32 %v946_v63, %v926_v31  ;;  %v982_v35 = vadd.f32 %v1885_v29, %v959_v18  ;;  %v927_v55 = vadd.f32 %v911_v36, %v891_v2  ;;  %v928_v37 = vadd.f32 %v912_v60, %v892_v5  ;;  %v1921_v31 = vld [vmem:[#allocation2 + $0x81] sm:$0xff] }
 0x10e   : > { %v983_v9 = vadd.f32 %v1885_v29, %v960_v48  ;;  %v984_v45 = vadd.f32 %v1885_v29, %v961_v3  ;;  %v621_v41 = vmul.f32 %v1683_v13, %v1731_v58  ;;  %v622_v4 = vmul.f32 %v1683_v13, %v1765_v21 }
 0x10f   : > { %v985_v40 = vadd.f32 %v1885_v29, %v962_v32  ;;  %v998_v54 = vmax.f32 %v982_v35, 0.0  ;;  %v963_v23 = vadd.f32 %v947_v33, %v927_v55  ;;  %v964_v49 = vadd.f32 %v948_v50, %v928_v37  ;;  %v1932_v33 = vld [vmem:[#allocation2 + $0x7a] sm:$0xff]  ;;  %v1934_v50 = vld [vmem:[#allocation2 + $0x82] sm:$0xff] }
 0x110   : > { %v999_v43 = vmax.f32 %v983_v9, 0.0  ;;  %v1000_v38 = vmax.f32 %v984_v45, 0.0  ;;  %v657_v42 = vmul.f32 %v1685_v14, %v1792_v6  ;;  %v658_v56 = vmul.f32 %v1685_v14, %v1813_v44 }
 0x111   : > { %v1001_v10 = vmax.f32 %v985_v40, 0.0  ;;  %v1014_v34 = vmin.f32 %v998_v54, 6.0  ;;  %v986_v58 = vadd.f32 %v1885_v29, %v963_v23  ;;  %v987_v21 = vadd.f32 %v1885_v29, %v964_v49 }
 0x112   : > { %v1015_v57 = vmin.f32 %v999_v43, 6.0  ;;  %v1016_v2 = vmin.f32 %v1000_v38, 6.0  ;;  %v673_v61 = vadd.f32 %v657_v42, %v621_v41  ;;  %v674_v7 = vadd.f32 %v658_v56, %v622_v4  ;;  %v1948_v41 = vld [vmem:[#allocation2 + $0x90] sm:$0xff]  ;;  %v1950_v4 = vld [vmem:[#allocation2 + $0x98] sm:$0xff] }
 0x113   : > { %v1017_v5 = vmin.f32 %v1001_v10, 6.0  ;;  %v1002_v20 = vmax.f32 %v986_v58, 0.0  ;;  %v1003_v62 = vmax.f32 %v987_v21, 0.0  ;;  %v693_v28 = vmul.f32 %v1696_v24, %v1907_v52  ;;  %v1966_v38 = vld [vmem:[#allocation2 + $0x91] sm:$0xff]  ;;  %v1968_v10 = vld [vmem:[#allocation2 + $0x99] sm:$0xff] }
 0x114   : > { %v1030_v19 = vpack.c.bf16 %v1015_v57, %v1014_v34  ;;  %v694_v63 = vmul.f32 %v1696_v24, %v1915_v59  ;;  %v785_v18 = vmul.f32 %v1689_v16, %v1795_v17  ;;  %v786_v48 = vmul.f32 %v1689_v16, %v1815_v47 }
 0x115   : > { %v1031_v39 = vpack.c.bf16 %v1017_v5, %v1016_v2  ;;  %v1018_v36 = vmin.f32 %v1002_v20, 6.0  ;;  %v1019_v60 = vmin.f32 %v1003_v62, 6.0  ;;  %v709_v3 = vadd.f32 %v693_v28, %v673_v61  ;;  %v1978_v2 = vld [vmem:[#allocation2 + $0x92] sm:$0xff] }
 0x116   : > { %1392 = vmatprep.mubr.msk.bf16.mxu1 %vm561_vm4, %v1030_v19  ;;  %v821_v32 = vmul.f32 %v1698_v25, %v1917_v12  ;;  %v710_v35 = vadd.f32 %v694_v63, %v674_v7  ;;  %v822_v17 = vmul.f32 %v1698_v25, %v1921_v31  ;;  %v877_v47 = vmul.f32 %v1700_v26, %v1869_v0  ;;  %v1984_v19 = vld [vmem:[#allocation2 + $0x9a] sm:$0xff] }
 0x117   : > { %1393 = vmatmul.mubr.msk.bf16.vlgmr.msra.gmra.mxu1 %vm561_vm4, %v1031_v39  ;;  %v878_v9 = vmul.f32 %v1700_v26, %v1871_v1  ;;  %v1032_v55 = vpack.c.bf16 %v1019_v60, %v1018_v36  ;;  %v765_v37 = vadd.f32 %v1760_v11, %v709_v3  ;;  %v913_v45 = vmul.f32 %v1704_v30, %v1878_v22 }
 0x118   : > { %v914_v40 = vmul.f32 %v1704_v30, %v1880_v46  ;;  %v766_v54 = vadd.f32 %v1799_v8, %v710_v35  ;;  %v949_v0 = vmul.f32 %v1864_v53, %v1932_v33  ;;  %v950_v1 = vmul.f32 %v1864_v53, %v1934_v50 }
 0x119   : > { %v623_v11 = vmul.f32 %v1683_v13, %v1792_v6  ;;  %1396 = vmatprep.mubr.msk.bf16.mxu1 %vm561_vm4, %v1032_v55  ;;  %v801_v43 = vadd.f32 %v785_v18, %v765_v37  ;;  %v624_v23 = vmul.f32 %v1683_v13, %v1813_v44  ;;  %v659_v49 = vmul.f32 %v1685_v14, %v1907_v52 }
 0x11a   : > { %v660_v8 = vmul.f32 %v1685_v14, %v1915_v59  ;;  %v802_v42 = vadd.f32 %v786_v48, %v766_v54  ;;  %v695_v6 = vmul.f32 %v1696_v24, %v1948_v41  ;;  %v696_v56 = vmul.f32 %v1696_v24, %v1950_v4 }
 0x11b   : > { %v787_v44 = vmul.f32 %v1689_v16, %v1917_v12  ;;  %v837_v34 = vadd.f32 %v821_v32, %v801_v43  ;;  %v675_v57 = vadd.f32 %v659_v49, %v623_v11  ;;  %v788_v21 = vmul.f32 %v1689_v16, %v1921_v31 }
 0x11c   : > { %v676_v58 = vadd.f32 %v660_v8, %v624_v23  ;;  %v838_v5 = vadd.f32 %v822_v17, %v802_v42  ;;  %v823_v61 = vmul.f32 %v1698_v25, %v1966_v38  ;;  %v824_v7 = vmul.f32 %v1698_v25, %v1968_v10  ;;  %v2000_v17 = vld [vmem:[#allocation2 + $0xa8] sm:$0xff] }
 0x11d   : > { %v879_v20 = vmul.f32 %v1700_v26, %v1878_v22  ;;  %v893_v62 = vadd.f32 %v877_v47, %v837_v34  ;;  %v711_v28 = vadd.f32 %v695_v6, %v675_v57  ;;  %v880_v63 = vmul.f32 %v1700_v26, %v1880_v46  ;;  %v2002_v46 = vld [vmem:[#allocation2 + $0xb0] sm:$0xff] }
 0x11e   : > { %v712_v39 = vadd.f32 %v696_v56, %v676_v58  ;;  %v894_v18 = vadd.f32 %v878_v9, %v838_v5  ;;  %v915_v48 = vmul.f32 %v1704_v30, %v1932_v33  ;;  %v916_v36 = vmul.f32 %v1704_v30, %v1934_v50  ;;  %v2022_v58 = vld [vmem:[#allocation2 + $0xa9] sm:$0xff] }
 0x11f   : > { %v951_v60 = vmul.f32 %v1864_v53, %v1978_v2  ;;  %v929_v3 = vadd.f32 %v913_v45, %v893_v62  ;;  %v767_v32 = vadd.f32 %v1808_v27, %v711_v28  ;;  %v952_v35 = vmul.f32 %v1864_v53, %v1984_v19 }
 0x120   : > { %v768_v22 = vadd.f32 %v1830_v51, %v712_v39  ;;  %v930_v47 = vadd.f32 %v914_v40, %v894_v18  ;;  %v625_v9 = vmul.f32 %v1683_v13, %v1907_v52  ;;  %v626_v55 = vmul.f32 %v1683_v13, %v1915_v59 }
 0x121   : > { %v661_v37 = vmul.f32 %v1685_v14, %v1948_v41  ;;  %v965_v27 = vadd.f32 %v949_v0, %v929_v3  ;;  %v803_v45 = vadd.f32 %v787_v44, %v767_v32  ;;  %v662_v54 = vmul.f32 %v1685_v14, %v1950_v4 }
 0x122   : > { %v804_v51 = vadd.f32 %v788_v21, %v768_v22  ;;  %v966_v11 = vadd.f32 %v950_v1, %v930_v47  ;;  %v697_v40 = vmul.f32 %v1696_v24, %v2000_v17  ;;  %v698_v52 = vmul.f32 %v1696_v24, %v2002_v46  ;;  %v2024_v21 = vld [vmem:[#allocation2 + $0xb1] sm:$0xff] }
 0x123   : > { %v677_v43 = vadd.f32 %v661_v37, %v625_v9  ;;  %v988_v23 = vadd.f32 %v1885_v29, %v965_v27  ;;  %v839_v59 = vadd.f32 %v823_v61, %v803_v45  ;;  %v678_v8 = vadd.f32 %v662_v54, %v626_v55  ;;  %v2034_v9 = vld [vmem:[#allocation2 + $0xaa] sm:$0xff]  ;;  %v2036_v55 = vld [vmem:[#allocation2 + $0xb2] sm:$0xff] }
 0x124   : > { %v840_v49 = vadd.f32 %v824_v7, %v804_v51  ;;  %v989_v0 = vadd.f32 %v1885_v29, %v966_v11  ;;  %v753_v6 = vmul.f32 %v1687_v15, %v1917_v12  ;;  %v754_v1 = vmul.f32 %v1687_v15, %v1921_v31  ;;  %v607_v11 = vld [vmem:[#allocation2 + $0xc0] sm:$0xff] }
 0x125   : > { %v713_v42 = vadd.f32 %v697_v40, %v677_v43  ;;  %v1004_v56 = vmax.f32 %v988_v23, 0.0  ;;  %v895_v44 = vadd.f32 %v879_v20, %v839_v59  ;;  %v714_v57 = vadd.f32 %v698_v52, %v678_v8  ;;  %v608_v40 = vld [vmem:[#allocation2 + $0xc8] sm:$0xff] }
 0x126   : > { %v896_v34 = vadd.f32 %v880_v63, %v840_v49  ;;  %v1005_v5 = vmax.f32 %v989_v0, 0.0  ;;  %v789_v7 = vmul.f32 %v1689_v16, %v1966_v38  ;;  %v790_v62 = vmul.f32 %v1689_v16, %v1968_v10 }
 0x127   : > { %v769_v61 = vadd.f32 %v753_v6, %v713_v42  ;;  %v1020_v12 = vmin.f32 %v1004_v56, 6.0  ;;  %v931_v28 = vadd.f32 %v915_v48, %v895_v44  ;;  %v770_v31 = vadd.f32 %v754_v1, %v714_v57 }
 0x128   : > { %v932_v39 = vadd.f32 %v916_v36, %v896_v34  ;;  %v1021_v18 = vmin.f32 %v1005_v5, 6.0  ;;  %v825_v63 = vmul.f32 %v1698_v25, %v2022_v58  ;;  %v826_v3 = vmul.f32 %v1698_v25, %v2024_v21 }
 0x129   : > { %v805_v20 = vadd.f32 %v789_v7, %v769_v61  ;;  %v967_v32 = vadd.f32 %v951_v60, %v931_v28  ;;  %v806_v47 = vadd.f32 %v790_v62, %v770_v31  ;;  %v881_v48 = vmul.f32 %v1700_v26, %v1932_v33  ;;  %v735_v31 = vld [vmem:[#allocation2 + $0xc1] sm:$0xff] }
 0x12a   : > { %v968_v22 = vadd.f32 %v952_v35, %v932_v39  ;;  %v1033_v36 = vpack.c.bf16 %v1021_v18, %v1020_v12  ;;  %v882_v27 = vmul.f32 %v1700_v26, %v1934_v50  ;;  %v917_v45 = vmul.f32 %v1704_v30, %v1978_v2  ;;  %v736_v18 = vld [vmem:[#allocation2 + $0xc9] sm:$0xff] }
 0x12b   : > { %v841_v37 = vadd.f32 %v825_v63, %v805_v20  ;;  %v990_v51 = vadd.f32 %v1885_v29, %v967_v32  ;;  %v842_v35 = vadd.f32 %v826_v3, %v806_v47  ;;  %v918_v54 = vmul.f32 %v1704_v30, %v1984_v19 }
 0x12c   : > { %v991_v60 = vadd.f32 %v1885_v29, %v968_v22  ;;  %1397 = vmatmul.mubr.msk.bf16.gmra.mxu1 %vm561_vm4, %v1033_v36  ;;  %v953_v43 = vmul.f32 %v1864_v53, %v2034_v9  ;;  %v954_v50 = vmul.f32 %v1864_v53, %v2036_v55  ;;  %v627_v52 = vmul.f32 %v1683_v13, %v1948_v41 }
 0x12d   : > { %v897_v33 = vadd.f32 %v881_v48, %v841_v37  ;;  %v1006_v23 = vmax.f32 %v990_v51, 0.0  ;;  %v898_v49 = vadd.f32 %v882_v27, %v842_v35  ;;  %v628_v8 = vmul.f32 %v1683_v13, %v1950_v4  ;;  %v609_v35 = vld [vmem:[#allocation2 + $0xd8] sm:$0xff] }
 0x12e   : > { %v1007_v59 = vmax.f32 %v991_v60, 0.0  ;;  %v663_v42 = vmul.f32 %v1685_v14, %v2000_v17  ;;  %v664_v6 = vmul.f32 %v1685_v14, %v2002_v46  ;;  %v699_v1 = vmul.f32 %v1696_v24, %v607_v11 }
 0x12f   : > { %v933_v0 = vadd.f32 %v917_v45, %v897_v33  ;;  %v1022_v56 = vmin.f32 %v1006_v23, 6.0  ;;  %v934_v34 = vadd.f32 %v918_v54, %v898_v49  ;;  %v700_v41 = vmul.f32 %v1696_v24, %v608_v40  ;;  %v864_v49 = vld [vmem:[#allocation2 + $0xca] sm:$0xff] }
 0x130   : > { %v1023_v44 = vmin.f32 %v1007_v59, 6.0  ;;  %v679_v5 = vadd.f32 %v663_v42, %v627_v52  ;;  %v680_v61 = vadd.f32 %v664_v6, %v628_v8  ;;  %v755_v4 = vmul.f32 %v1687_v15, %v1966_v38 }
 0x131   : > { %v969_v57 = vadd.f32 %v953_v43, %v933_v0  ;;  %v970_v62 = vadd.f32 %v954_v50, %v934_v34  ;;  %v756_v20 = vmul.f32 %v1687_v15, %v1968_v10  ;;  %v791_v3 = vmul.f32 %v1689_v16, %v2022_v58  ;;  %v610_v43 = vld [vmem:[#allocation2 + $0xe0] sm:$0xff] }
 0x132   : > { %v1034_v7 = vpack.c.bf16 %v1023_v44, %v1022_v56  ;;  %v715_v28 = vadd.f32 %v699_v1, %v679_v5  ;;  %v716_v39 = vadd.f32 %v700_v41, %v680_v61  ;;  %v792_v38 = vmul.f32 %v1689_v16, %v2024_v21  ;;  %v737_v5 = vld [vmem:[#allocation2 + $0xd9] sm:$0xff] }
 0x133   : > { %v992_v12 = vadd.f32 %v1885_v29, %v969_v57  ;;  %v993_v63 = vadd.f32 %v1885_v29, %v970_v62  ;;  %v827_v36 = vmul.f32 %v1698_v25, %v735_v31  ;;  %v828_v37 = vmul.f32 %v1698_v25, %v736_v18 }
 0x134   : > { %1400 = vmatprep.mubr.msk.bf16.mxu1 %vm561_vm4, %v1034_v7  ;;  %v771_v22 = vadd.f32 %v755_v4, %v715_v28  ;;  %v772_v47 = vadd.f32 %v756_v20, %v716_v39  ;;  %v883_v10 = vmul.f32 %v1700_v26, %v1978_v2  ;;  %v884_v51 = vmul.f32 %v1700_v26, %v1984_v19  ;;  %v863_v2 = vld [vmem:[#allocation2 + $0xc2] sm:$0xff] }
 0x135   : > { %v1008_v32 = vmax.f32 %v992_v12, 0.0  ;;  %v1009_v48 = vmax.f32 %v993_v63, 0.0  ;;  %v919_v60 = vmul.f32 %v1704_v30, %v2034_v9  ;;  %v629_v50 = vmul.f32 %v1683_v13, %v2000_v17  ;;  %v738_v7 = vld [vmem:[#allocation2 + $0xe1] sm:$0xff] }
 0x136   : > { %v807_v27 = vadd.f32 %v791_v3, %v771_v22  ;;  %v808_v45 = vadd.f32 %v792_v38, %v772_v47  ;;  %v665_v52 = vmul.f32 %v1685_v14, %v607_v11  ;;  %v630_v8 = vmul.f32 %v1683_v13, %v2002_v46 }
 0x137   : > { %v1024_v54 = vmin.f32 %v1008_v32, 6.0  ;;  %v1025_v33 = vmin.f32 %v1009_v48, 6.0  ;;  %v666_v19 = vmul.f32 %v1685_v14, %v608_v40  ;;  %v920_v42 = vmul.f32 %v1704_v30, %v2036_v55  ;;  %v865_v48 = vld [vmem:[#allocation2 + $0xda] sm:$0xff] }
 0x138   : > { %v843_v23 = vadd.f32 %v827_v36, %v807_v27  ;;  %v844_v59 = vadd.f32 %v828_v37, %v808_v45  ;;  %v681_v6 = vadd.f32 %v665_v52, %v629_v50  ;;  %v701_v1 = vmul.f32 %v1696_v24, %v609_v35 }
 0x139   : > { %v1035_v0 = vpack.c.bf16 %v1025_v33, %v1024_v54  ;;  %v682_v44 = vadd.f32 %v666_v19, %v630_v8  ;;  %v702_v11 = vmul.f32 %v1696_v24, %v610_v43  ;;  %v955_v34 = vmul.f32 %v1864_v53, %v863_v2  ;;  %v1454_v8 = vld [vmem:[%s1593_s15 + $0x20] sm:$0xff] }
 0x13a   : > { %v899_v56 = vadd.f32 %v883_v10, %v843_v23  ;;  %v900_v17 = vadd.f32 %v884_v51, %v844_v59  ;;  %v956_v13 = vmul.f32 %v1864_v53, %v864_v49  ;;  %v717_v46 = vadd.f32 %v701_v1, %v681_v6  ;;  %v1455_v6 = vld [vmem:[%s1593_s15 + $0x10] sm:$0xff] }
 0x13b   : > { %1401 = vmatmul.mubr.msk.bf16.gmra.mxu1 %vm561_vm4, %v1035_v0  ;;  %v757_v14 = vmul.f32 %v1687_v15, %v2022_v58  ;;  %v718_v57 = vadd.f32 %v702_v11, %v682_v44  ;;  %v758_v61 = vmul.f32 %v1687_v15, %v2024_v21  ;;  %v793_v24 = vmul.f32 %v1689_v16, %v735_v31  ;;  %v1456_v44 = vld [vmem:[%s1593_s15 + $0x28] sm:$0xff] }
 0x13c   : > { %v935_v40 = vadd.f32 %v919_v60, %v899_v56  ;;  %v936_v41 = vadd.f32 %v920_v42, %v900_v17  ;;  %v794_v39 = vmul.f32 %v1689_v16, %v736_v18  ;;  %v829_v63 = vmul.f32 %v1698_v25, %v737_v5  ;;  %v866_v18 = vld [vmem:[#allocation2 + $0xe2] sm:$0xff] }
 0x13d   : > { %v773_v62 = vadd.f32 %v757_v14, %v717_v46  ;;  %v774_v28 = vadd.f32 %v758_v61, %v718_v57  ;;  %v830_v22 = vmul.f32 %v1698_v25, %v738_v7  ;;  %v885_v21 = vmul.f32 %v1700_v26, %v2034_v9  ;;  %v1458_v57 = vld [vmem:[%s1593_s15 + $0x40] sm:$0xff] }
 0x13e   : > { %v971_v4 = vadd.f32 %v955_v34, %v935_v40  ;;  %v972_v12 = vadd.f32 %v956_v13, %v936_v41  ;;  %v886_v16 = vmul.f32 %v1700_v26, %v2036_v55  ;;  %v921_v37 = vmul.f32 %v1704_v30, %v863_v2  ;;  %v1457_v13 = vld [vmem:[%s1593_s15 + $0x18] sm:$0xff] }
 0x13f   : > { %v809_v20 = vadd.f32 %v793_v24, %v773_v62  ;;  %v810_v32 = vadd.f32 %v794_v39, %v774_v28  ;;  %v922_v25 = vmul.f32 %v1704_v30, %v864_v49  ;;  %v957_v9 = vmul.f32 %v1864_v53, %v865_v48  ;;  %v1459_v62 = vld [vmem:[%s1593_s15 + $0x30] sm:$0xff]  ;;  %v1460_v28 = vld [vmem:[%s1593_s15 + $0x48] sm:$0xff] }
 0x140   : > { %v994_v58 = vadd.f32 %v1885_v29, %v971_v4  ;;  %v995_v3 = vadd.f32 %v1885_v29, %v972_v12  ;;  %v958_v54 = vmul.f32 %v1864_v53, %v866_v18  ;;  %v2123_v53 = vld [vmem:[%s2215_s6] ss:$0 sm:$0xff] }
 0x141   : > { %v845_v15 = vadd.f32 %v829_v63, %v809_v20  ;;  %v846_v38 = vadd.f32 %v830_v22, %v810_v32  ;;  %v1461_v63 = vld [vmem:[%s1593_s15 + $0x38] sm:$0xff] }
 0x142   : > { %v1010_v31 = vmax.f32 %v994_v58, 0.0  ;;  %v1011_v47 = vmax.f32 %v995_v3, 0.0 }
 0x143   : > { %v901_v36 = vadd.f32 %v885_v21, %v845_v15  ;;  %v902_v45 = vadd.f32 %v886_v16, %v846_v38  ;;  %v1462_v15 = vld [vmem:[%s1593_s15 + $0x60] sm:$0xff]  ;;  %v1463_v38 = vld [vmem:[%s1593_s15 + $0x50] sm:$0xff] }
 0x144   : > { %v1026_v10 = vmin.f32 %v1010_v31, 6.0  ;;  %v1027_v27 = vmin.f32 %v1011_v47, 6.0 }
 0x145   : > { %v937_v51 = vadd.f32 %v921_v37, %v901_v36  ;;  %v938_v35 = vadd.f32 %v922_v25, %v902_v45  ;;  %v1464_v36 = vld [vmem:[%s1593_s15 + $0x68] sm:$0xff] }
 0x146   : > { %v1036_v60 = vpack.c.bf16 %v1027_v27, %v1026_v10  ;;  %v1465_v27 = vld [vmem:[%s1593_s15 + $0x58] sm:$0xff] }
 0x147   : > { %v973_v26 = vadd.f32 %v957_v9, %v937_v51  ;;  %v974_v55 = vadd.f32 %v958_v54, %v938_v35 }
 0x148   : > { %1404 = vmatprep.mubr.msk.bf16.mxu1 %vm561_vm4, %v1036_v60  ;;  %v1466_v60 = vld [vmem:[%s1593_s15 + $0x80] sm:$0xff] }
 0x149   : > { %v996_v33 = vadd.f32 %v1885_v29, %v973_v26  ;;  %v997_v43 = vadd.f32 %v1885_v29, %v974_v55  ;;  %v1467_v55 = vld [vmem:[%s1593_s15 + $0x70] sm:$0xff] }
 0x14b   : > { %v1012_v50 = vmax.f32 %v996_v33, 0.0  ;;  %v1013_v30 = vmax.f32 %v997_v43, 0.0 }
 0x14d   : > { %v1028_v52 = vmin.f32 %v1012_v50, 6.0  ;;  %v1029_v23 = vmin.f32 %v1013_v30, 6.0  ;;  %v1468_v30 = vld [vmem:[%s1593_s15 + $0x88] sm:$0xff] }
 0x14f   : > { %v1037_v59 = vpack.c.bf16 %v1029_v23, %v1028_v52 }
 0x151   : > { %1405 = vmatmul.mubr.msk.bf16.gmra.mxu1 %vm561_vm4, %v1037_v59  ;;  %v1469_v59 = vld [vmem:[%s1593_s15 + $0x78] sm:$0xff] }
 0x1d7   : > { %v1394_v29 = vpop.f32.mrf.mxu1 }
 0x1d8   : > { %v1128_v2 = vadd.f32 %v1394_v29, %v2123_v53 }
 0x1d9   : > { %v1119_v49 = vpop.f32.mrf.mxu1 }
 0x1da   : > { %v1184_v19 = vadd.f32 %v1454_v8, %v1128_v2  ;;  %v1120_v0 = vadd.f32 %v2123_v53, %v1119_v49 }
 0x1db   : > { %v1395_v42 = vpop.f32.mrf.mxu1 }
 0x1dc   : > { %1200 = vst.msk [vmem:[%s2129_s9 + $0x10] sm:$0xff] %vm346_vm1, %v1184_v19  ;;  %v1182_v1 = vadd.f32 %v1455_v6, %v1120_v0  ;;  %v1131_v56 = vadd.f32 %v1395_v42, %v2123_v53 }
 0x1dd   : > { %v1122_v17 = vpop.f32.mrf.mxu1 }
 0x1de   : > { %1198 = vst.msk [vmem:[%s2129_s9] sm:$0xff] %vm346_vm1, %v1182_v1  ;;  %v1185_v11 = vadd.f32 %v1456_v44, %v1131_v56  ;;  %v1123_v34 = vadd.f32 %v2123_v53, %v1122_v17 }
 0x1e0   : > { %1201 = vst.msk [vmem:[%s2129_s9 + $0x18] sm:$0xff] %vm346_vm1, %v1185_v11  ;;  %v1183_v46 = vadd.f32 %v1457_v13, %v1123_v34 }
 0x1e2   : > { %1199 = vst.msk [vmem:[%s2129_s9 + $0x8] sm:$0xff] %vm346_vm1, %v1183_v46 }
 0x1ec   : > { %v1398_v14 = vpop.f32.mrf.mxu1 }
 0x1ed   : > { %v1144_v40 = vadd.f32 %v1398_v14, %v2123_v53 }
 0x1ee   : > { %v1135_v41 = vpop.f32.mrf.mxu1 }
 0x1ef   : > { %v1188_v5 = vadd.f32 %v1458_v57, %v1144_v40  ;;  %v1136_v61 = vadd.f32 %v2123_v53, %v1135_v41 }
 0x1f0   : > { %v1399_v7 = vpop.f32.mrf.mxu1 }
 0x1f1   : > { %1204 = vst.msk [vmem:[%s2129_s9 + $0x30] sm:$0xff] %vm346_vm1, %v1188_v5  ;;  %v1186_v24 = vadd.f32 %v1459_v62, %v1136_v61  ;;  %v1147_v4 = vadd.f32 %v1399_v7, %v2123_v53 }
 0x1f2   : > { %v1138_v12 = vpop.f32.mrf.mxu1 }
 0x1f3   : > { %1202 = vst.msk [vmem:[%s2129_s9 + $0x20] sm:$0xff] %vm346_vm1, %v1186_v24  ;;  %v1189_v39 = vadd.f32 %v1460_v28, %v1147_v4  ;;  %v1139_v20 = vadd.f32 %v2123_v53, %v1138_v12 }
 0x1f5   : > { %1205 = vst.msk [vmem:[%s2129_s9 + $0x38] sm:$0xff] %vm346_vm1, %v1189_v39  ;;  %v1187_v58 = vadd.f32 %v1461_v63, %v1139_v20 }
 0x1f7   : > { %1203 = vst.msk [vmem:[%s2129_s9 + $0x28] sm:$0xff] %vm346_vm1, %v1187_v58 }
 0x1fb   : > { %v1402_v3 = vpop.f32.mrf.mxu1 }
 0x1fc   : > { %v1160_v32 = vadd.f32 %v1402_v3, %v2123_v53 }
 0x1fd   : > { %v1151_v22 = vpop.f32.mrf.mxu1 }
 0x1fe   : > { %v1192_v21 = vadd.f32 %v1462_v15, %v1160_v32  ;;  %v1152_v31 = vadd.f32 %v2123_v53, %v1151_v22 }
 0x1ff   : > { %v1403_v47 = vpop.f32.mrf.mxu1 }
 0x200   : > { %1208 = vst.msk [vmem:[%s2129_s9 + $0x50] sm:$0xff] %vm346_vm1, %v1192_v21  ;;  %v1190_v48 = vadd.f32 %v1463_v38, %v1152_v31  ;;  %v1163_v16 = vadd.f32 %v1403_v47, %v2123_v53 }
 0x201   : > { %v1154_v18 = vpop.f32.mrf.mxu1 }
 0x202   : > { %1206 = vst.msk [vmem:[%s2129_s9 + $0x40] sm:$0xff] %vm346_vm1, %v1190_v48  ;;  %v1193_v37 = vadd.f32 %v1464_v36, %v1163_v16  ;;  %v1155_v10 = vadd.f32 %v2123_v53, %v1154_v18 }
 0x204   : > { %1209 = vst.msk [vmem:[%s2129_s9 + $0x58] sm:$0xff] %vm346_vm1, %v1193_v37  ;;  %v1191_v45 = vadd.f32 %v1465_v27, %v1155_v10 }
 0x206   : > { %1207 = vst.msk [vmem:[%s2129_s9 + $0x48] sm:$0xff] %vm346_vm1, %v1191_v45 }
 0x211   : > { %v1406_v25 = vpop.f32.mrf.mxu1 }
 0x212   : > { %v1176_v51 = vadd.f32 %v1406_v25, %v2123_v53 }
 0x213   : > { %v1167_v9 = vpop.f32.mrf.mxu1 }
 0x214   : > { %v1196_v35 = vadd.f32 %v1466_v60, %v1176_v51  ;;  %v1168_v54 = vadd.f32 %v2123_v53, %v1167_v9 }
 0x215   : > { %v1407_v26 = vpop.f32.mrf.mxu1 }
 0x216   : > { %1212 = vst.msk [vmem:[%s2129_s9 + $0x70] sm:$0xff] %vm346_vm1, %v1196_v35  ;;  %v1194_v33 = vadd.f32 %v1467_v55, %v1168_v54  ;;  %v1179_v43 = vadd.f32 %v1407_v26, %v2123_v53 }
 0x217   : > { %v1170_v50 = vpop.f32.mrf.mxu1 }
 0x218   : > { %1210 = vst.msk [vmem:[%s2129_s9 + $0x60] sm:$0xff] %vm346_vm1, %v1194_v33  ;;  %v1197_v52 = vadd.f32 %v1468_v30, %v1179_v43  ;;  %v1171_v23 = vadd.f32 %v2123_v53, %v1170_v50 }
 0x21a   : > { %1213 = vst.msk [vmem:[%s2129_s9 + $0x78] sm:$0xff] %vm346_vm1, %v1197_v52  ;;  %v1195_v29 = vadd.f32 %v1469_v59, %v1171_v23 }
 0x21c   : > { %1211 = vst.msk [vmem:[%s2129_s9 + $0x68] sm:$0xff] %vm346_vm1, %v1195_v29 }
 0x21d PF: > { %s17_s28 = sadd.s32 1, %s1508_s28   ;;  %s2218_s24 = smov %s1500_s26 }
 0x21e   : > { %p14_p9 = scmp.ge.s32.totalorder %s17_s28, 6   ;;  %s2219_s25 = smov %s1504_s27 }
 0x21f   : > { %s2220_s26 = smov %s2223_s29  ;;  %s2221_s27 = smov %s2227_s30 }
 0x220   :  { %16 = sbr.rel (!%p14_p9) target bundleno = 3 (0x3), region = 81 }

</bundles_post_ra>
